<compile_context>
chip_gen: v6e
topology: v6e:2x2x1
jax: 0.10.0
libtpu: 0.0.40
codegen_flags: <defaults>
</compile_context>

<pallas_src>
import math

import jax
import jax.numpy as jnp
from jax.experimental import pallas as pl
from jax.experimental.pallas import tpu as pltpu

BN_EPS = 1e-5
NEG_SLOPE = 0.2


# ----------------------------- shared math ---------------------------------

def _bn_train_folded(h, gamma, beta):
    """BatchNorm1d training-mode (biased batch variance), folded form.

    Single-pass stats (sum, sum-of-squares) -> per-feature scale/shift rows,
    then one fused h*scale + shift over the (B, F) tensor.
    """
    inv_n = 1.0 / h.shape[0]
    s = jnp.sum(h, axis=0, keepdims=True)
    ss = jnp.sum(h * h, axis=0, keepdims=True)
    mu = s * inv_n
    var = jnp.maximum(ss * inv_n - mu * mu, 0.0)       # biased batch variance
    scale = gamma * jax.lax.rsqrt(var + BN_EPS)
    shift = beta - mu * scale
    return h * scale + shift


def _leaky_relu(h):
    # max(h, 0.2*h) == LeakyReLU(0.2) since 0 < slope < 1.
    return jnp.maximum(h, NEG_SLOPE * h)


def _dot_bf16(a, w_bf16):
    # bf16 MXU inputs, f32 accumulation.
    return jnp.dot(a.astype(jnp.bfloat16), w_bf16,
                   preferred_element_type=jnp.float32)


# ------------------------------- kernel -------------------------------------

def vae_kernel(
    # data
    x_ref, eps_ref,
    # encoder
    w1_ref, b1_ref, g1_ref, be1_ref,
    w2_ref, b2_ref, g2_ref, be2_ref,
    # fused mean|logvar head: (latent, 2*latent) bf16 weight, (1, 2*latent) f32 bias
    wh_ref, bh_ref,
    # decoder
    wd1_ref, bd1_ref, gd1_ref, bed1_ref,
    wd2_ref, bd2_ref, gd2_ref, bed2_ref,
    wd3_ref, bd3_ref,
    # outputs
    xhat_ref, mv_ref,
):
    latent_dim = eps_ref.shape[1]
    x = x_ref[...]

    # ---- encoder ----
    h = _dot_bf16(x, w1_ref[...]) + b1_ref[...]
    h = _leaky_relu(_bn_train_folded(h, g1_ref[...], be1_ref[...]))
    h = _dot_bf16(h, w2_ref[...]) + b2_ref[...]
    h = _leaky_relu(_bn_train_folded(h, g2_ref[...], be2_ref[...]))

    # ---- fused mean|logvar head: one lane-dense (B, 2*latent) matmul ----
    mv = _dot_bf16(h, wh_ref[...]) + bh_ref[...]
    mean = mv[:, :latent_dim]
    logvar = mv[:, latent_dim:]

    # ---- reparameterization (exp on the EUP slot, f32) ----
    z = mean + jnp.exp(0.5 * logvar) * eps_ref[...]

    # ---- decoder ----
    d = _dot_bf16(z, wd1_ref[...]) + bd1_ref[...]
    d = _leaky_relu(_bn_train_folded(d, gd1_ref[...], bed1_ref[...]))
    d = _dot_bf16(d, wd2_ref[...]) + bd2_ref[...]
    d = _leaky_relu(_bn_train_folded(d, gd2_ref[...], bed2_ref[...]))
    d = jnp.tanh(_dot_bf16(d, wd3_ref[...]) + bd3_ref[...])

    xhat_ref[...] = d
    mv_ref[...] = mv   # packed (B, 2*latent_dim), lane-dense unmasked store


# ------------------------------- wrappers ------------------------------------

def prepare_params(p):
    """One-time prep (hoisted out of the per-call path): pack the two head
    projections into one lane-dense (L, 2L) weight and cast matmul weights to
    bf16 (halves their HBM->VMEM DMA bytes). Biases / BN params stay f32."""
    bf = lambda w: w.astype(jnp.bfloat16)
    return {
        "w1": bf(p["w1"]), "b1": p["b1"], "g1": p["g1"], "be1": p["be1"],
        "w2": bf(p["w2"]), "b2": p["b2"], "g2": p["g2"], "be2": p["be2"],
        "wh": bf(jnp.concatenate([p["wm"], p["wv"]], axis=1)),   # (L, 2L)
        "bh": jnp.concatenate([p["bm"], p["bv"]], axis=1),       # (1, 2L)
        "wd1": bf(p["wd1"]), "bd1": p["bd1"], "gd1": p["gd1"], "bed1": p["bed1"],
        "wd2": bf(p["wd2"]), "bd2": p["bd2"], "gd2": p["gd2"], "bed2": p["bed2"],
        "wd3": bf(p["wd3"]), "bd3": p["bd3"],
    }


def vae_forward_packed(x, eps, kp):
    """x: (B, input_dim) f32, eps: (B, latent_dim) f32, kp: prepared params.

    Returns (x_hat, mv) where mv is the packed (B, 2*latent_dim) mean|logvar
    output; the split is deferred to the consumer (avoids two extra XLA slice
    ops re-reading HBM behind a latency-bound micro-kernel).
    """
    B, input_dim = x.shape
    latent_dim = eps.shape[1]
    hidden_dim = kp["w1"].shape[1]

    args = [
        x, eps,
        kp["w1"], kp["b1"], kp["g1"], kp["be1"],
        kp["w2"], kp["b2"], kp["g2"], kp["be2"],
        kp["wh"], kp["bh"],
        kp["wd1"], kp["bd1"], kp["gd1"], kp["bed1"],
        kp["wd2"], kp["bd2"], kp["gd2"], kp["bed2"],
        kp["wd3"], kp["bd3"],
    ]

    out_shape = (
        jax.ShapeDtypeStruct((B, input_dim), jnp.float32),        # x_hat
        jax.ShapeDtypeStruct((B, 2 * latent_dim), jnp.float32),   # packed mean|logvar
    )

    # Advisory cost estimate so XLA can overlap surrounding ops.
    flops = 2 * B * (input_dim * hidden_dim + hidden_dim * latent_dim
                     + latent_dim * 2 * latent_dim + latent_dim * latent_dim
                     + latent_dim * hidden_dim + hidden_dim * input_dim)
    transcendentals = B * (latent_dim + input_dim)   # exp (reparam) + tanh (output)
    bytes_accessed = (
        sum(a.size * a.dtype.itemsize for a in args)
        + sum(math.prod(o.shape) * jnp.dtype(o.dtype).itemsize for o in out_shape)
    )

    vmem = pl.BlockSpec(memory_space=pltpu.MemorySpace.VMEM)
    x_hat, mv = pl.pallas_call(
        vae_kernel,
        out_shape=out_shape,
        in_specs=[vmem] * len(args),
        out_specs=(vmem, vmem),
        compiler_params=pltpu.CompilerParams(
            # Re-derived budget: <1 MiB resident at these shapes; 32 MiB leaves
            # headroom and stays under v7x's 64 MiB physical VMEM.
            vmem_limit_bytes=32 * 1024 * 1024,
        ),
        cost_estimate=pl.CostEstimate(
            flops=flops,
            transcendentals=transcendentals,
            bytes_accessed=bytes_accessed,
        ),
    )(*args)
    return x_hat, mv


def vae_forward(x, eps, kp):
    """PyTorch-API-shaped convenience wrapper: returns (x_hat, mean, logvar)."""
    latent_dim = eps.shape[1]
    x_hat, mv = vae_forward_packed(x, eps, kp)
    return x_hat, mv[:, :latent_dim], mv[:, latent_dim:]


# ------------------------------ init & refs ----------------------------------

def init_params(key, input_dim, hidden_dim, latent_dim):
    """Deterministic synthetic init. Linear weights ~ N(0, 1/fan_in); BN gamma=1, beta=0."""
    keys = jax.random.split(key, 8)

    def lin(k, fan_in, fan_out):
        kw, kb = jax.random.split(k)
        w = jax.random.normal(kw, (fan_in, fan_out), jnp.float32) / jnp.sqrt(
            jnp.float32(fan_in))
        b = 0.01 * jax.random.normal(kb, (1, fan_out), jnp.float32)
        return w, b

    p = {}
    # encoder
    p["w1"], p["b1"] = lin(keys[0], input_dim, hidden_dim)
    p["g1"] = jnp.ones((1, hidden_dim), jnp.float32)
    p["be1"] = jnp.zeros((1, hidden_dim), jnp.float32)
    p["w2"], p["b2"] = lin(keys[1], hidden_dim, latent_dim)
    p["g2"] = jnp.ones((1, latent_dim), jnp.float32)
    p["be2"] = jnp.zeros((1, latent_dim), jnp.float32)
    # heads
    p["wm"], p["bm"] = lin(keys[2], latent_dim, latent_dim)
    p["wv"], p["bv"] = lin(keys[3], latent_dim, latent_dim)
    # decoder
    p["wd1"], p["bd1"] = lin(keys[4], latent_dim, latent_dim)
    p["gd1"] = jnp.ones((1, latent_dim), jnp.float32)
    p["bed1"] = jnp.zeros((1, latent_dim), jnp.float32)
    p["wd2"], p["bd2"] = lin(keys[5], latent_dim, hidden_dim)
    p["gd2"] = jnp.ones((1, hidden_dim), jnp.float32)
    p["bed2"] = jnp.zeros((1, hidden_dim), jnp.float32)
    p["wd3"], p["bd3"] = lin(keys[6], hidden_dim, input_dim)
    return p


def vae_reference_matched(x, eps, kp):
    """Pure-JAX reference using the SAME math as the kernel (bf16 matmul
    operands, f32 accumulation, single-pass folded BN) for a tight check."""
    latent_dim = eps.shape[1]
    h = _dot_bf16(x, kp["w1"]) + kp["b1"]
    h = _leaky_relu(_bn_train_folded(h, kp["g1"], kp["be1"]))
    h = _dot_bf16(h, kp["w2"]) + kp["b2"]
    h = _leaky_relu(_bn_train_folded(h, kp["g2"], kp["be2"]))
    mv = _dot_bf16(h, kp["wh"]) + kp["bh"]
    mean, logvar = mv[:, :latent_dim], mv[:, latent_dim:]
    z = mean + jnp.exp(0.5 * logvar) * eps
    d = _dot_bf16(z, kp["wd1"]) + kp["bd1"]
    d = _leaky_relu(_bn_train_folded(d, kp["gd1"], kp["bed1"]))
    d = _dot_bf16(d, kp["wd2"]) + kp["bd2"]
    d = _leaky_relu(_bn_train_folded(d, kp["gd2"], kp["bed2"]))
    x_hat = jnp.tanh(_dot_bf16(d, kp["wd3"]) + kp["bd3"])
    return x_hat, mv


def vae_reference_f32(x, eps, p):
    """Full-f32, two-pass-BN PyTorch-semantics reference (loose semantic check)."""
    def bn(h, gamma, beta):
        mu = jnp.mean(h, axis=0, keepdims=True)
        var = jnp.mean((h - mu) ** 2, axis=0, keepdims=True)
        return (h - mu) * jax.lax.rsqrt(var + BN_EPS) * gamma + beta

    def lrelu(h):
        return jnp.where(h > 0, h, NEG_SLOPE * h)

    h = x @ p["w1"] + p["b1"]
    h = lrelu(bn(h, p["g1"], p["be1"]))
    h = h @ p["w2"] + p["b2"]
    h = lrelu(bn(h, p["g2"], p["be2"]))
    mean = h @ p["wm"] + p["bm"]
    logvar = h @ p["wv"] + p["bv"]
    z = mean + jnp.exp(0.5 * logvar) * eps
    d = z @ p["wd1"] + p["bd1"]
    d = lrelu(bn(d, p["gd1"], p["bed1"]))
    d = d @ p["wd2"] + p["bd2"]
    d = lrelu(bn(d, p["gd2"], p["bed2"]))
    x_hat = jnp.tanh(d @ p["wd3"] + p["bd3"])
    return x_hat, mean, logvar


# --------------------------------- main ---------------------------------------

if __name__ == "__main__":
    # Small shapes consistent with the module structure (input -> hidden -> latent).
    # B=128 fills the MXU rows; 2*latent = 128 makes the fused head output
    # exactly one lane-dense vreg column block.
    B, INPUT_DIM, HIDDEN_DIM, LATENT_DIM = 128, 256, 128, 64

    root = jax.random.PRNGKey(0)
    kx, keps, kparam = jax.random.split(root, 3)

    x = jax.random.normal(kx, (B, INPUT_DIM), jnp.float32)
    # torch.randn_like(logvar) equivalent: deterministic standard-normal noise
    # passed explicitly so the kernel is reproducible.
    eps = jax.random.normal(keps, (B, LATENT_DIM), jnp.float32)

    params = init_params(kparam, INPUT_DIM, HIDDEN_DIM, LATENT_DIM)
    kparams = prepare_params(params)   # one-time: packed head + bf16 weights

    fwd = jax.jit(vae_forward_packed)
    x_hat, mv = jax.block_until_ready(fwd(x, eps, kparams))
    mean, logvar = mv[:, :LATENT_DIM], mv[:, LATENT_DIM:]

    assert x_hat.shape == (B, INPUT_DIM)
    assert mean.shape == (B, LATENT_DIM) and logvar.shape == (B, LATENT_DIM)

    # Tight check: kernel vs. a reference using identical math (bf16 matmuls,
    # folded single-pass BN).
    x_hat_m, mv_m = vae_reference_matched(x, eps, kparams)
    assert jnp.allclose(x_hat, x_hat_m, atol=2e-3, rtol=2e-3)
    assert jnp.allclose(mv, mv_m, atol=2e-3, rtol=2e-3)

    # Loose semantic check: kernel vs. full-f32 two-pass-BN PyTorch-style
    # reference (bf16 matmul operands drift ~1e-2 over the 6-matmul path).
    x_hat_r, mean_r, logvar_r = vae_reference_f32(x, eps, params)
    assert jnp.allclose(x_hat, x_hat_r, atol=1e-1, rtol=1e-1)
    assert jnp.allclose(mean, mean_r, atol=1e-1, rtol=1e-1)
    assert jnp.allclose(logvar, logvar_r, atol=1e-1, rtol=1e-1)

    print("KERNEL_OK")
</pallas_src>

<mosaic_0001>
module attributes {stable_mosaic.version = 11 : i64} {
  func.func @vae_kernel(%arg0: memref<128x256xf32, #tpu.memory_space<vmem>>, %arg1: memref<128x64xf32, #tpu.memory_space<vmem>>, %arg2: memref<256x128xbf16, #tpu.memory_space<vmem>>, %arg3: memref<1x128xf32, #tpu.memory_space<vmem>>, %arg4: memref<1x128xf32, #tpu.memory_space<vmem>>, %arg5: memref<1x128xf32, #tpu.memory_space<vmem>>, %arg6: memref<128x64xbf16, #tpu.memory_space<vmem>>, %arg7: memref<1x64xf32, #tpu.memory_space<vmem>>, %arg8: memref<1x64xf32, #tpu.memory_space<vmem>>, %arg9: memref<1x64xf32, #tpu.memory_space<vmem>>, %arg10: memref<64x128xbf16, #tpu.memory_space<vmem>>, %arg11: memref<1x128xf32, #tpu.memory_space<vmem>>, %arg12: memref<64x64xbf16, #tpu.memory_space<vmem>>, %arg13: memref<1x64xf32, #tpu.memory_space<vmem>>, %arg14: memref<1x64xf32, #tpu.memory_space<vmem>>, %arg15: memref<1x64xf32, #tpu.memory_space<vmem>>, %arg16: memref<64x128xbf16, #tpu.memory_space<vmem>>, %arg17: memref<1x128xf32, #tpu.memory_space<vmem>>, %arg18: memref<1x128xf32, #tpu.memory_space<vmem>>, %arg19: memref<1x128xf32, #tpu.memory_space<vmem>>, %arg20: memref<128x256xbf16, #tpu.memory_space<vmem>>, %arg21: memref<1x256xf32, #tpu.memory_space<vmem>>, %arg22: memref<128x256xf32, #tpu.memory_space<vmem>>, %arg23: memref<128x128xf32, #tpu.memory_space<vmem>>) attributes {dimension_semantics = [], scalar_prefetch = 0 : i64, scratch_operands = 0 : i64, tpu.core_type = #tpu.core_type<tc>} {
    %c0 = arith.constant 0 : index
    %c0_0 = arith.constant 0 : index
    %0 = vector.load %arg0[%c0, %c0_0] : memref<128x256xf32, #tpu.memory_space<vmem>>, vector<128x256xf32>
    %c0_1 = arith.constant 0 : index
    %c0_2 = arith.constant 0 : index
    %1 = vector.load %arg2[%c0_1, %c0_2] : memref<256x128xbf16, #tpu.memory_space<vmem>>, vector<256x128xbf16>
    %2 = arith.truncf %0 : vector<128x256xf32> to vector<128x256xbf16>
    %cst = arith.constant dense<0.000000e+00> : vector<128x128xf32>
    %3 = tpu.matmul %2, %1, %cst {dimension_numbers = #tpu.dot_dimension_numbers<[1], [0], [0], [1], [0, 0, 1, 1], [], []>} : vector<128x256xbf16>, vector<256x128xbf16>, vector<128x128xf32> -> vector<128x128xf32>
    %c0_3 = arith.constant 0 : index
    %c0_4 = arith.constant 0 : index
    %4 = vector.load %arg3[%c0_3, %c0_4] : memref<1x128xf32, #tpu.memory_space<vmem>>, vector<1x128xf32>
    %5 = vector.broadcast %4 : vector<1x128xf32> to vector<128x128xf32>
    %6 = arith.addf %3, %5 : vector<128x128xf32>
    %c0_5 = arith.constant 0 : index
    %c0_6 = arith.constant 0 : index
    %7 = vector.load %arg4[%c0_5, %c0_6] : memref<1x128xf32, #tpu.memory_space<vmem>>, vector<1x128xf32>
    %c0_7 = arith.constant 0 : index
    %c0_8 = arith.constant 0 : index
    %8 = vector.load %arg5[%c0_7, %c0_8] : memref<1x128xf32, #tpu.memory_space<vmem>>, vector<1x128xf32>
    %cst_9 = arith.constant dense<0.000000e+00> : vector<128xf32>
    %9 = vector.multi_reduction <add>, %6, %cst_9 [0] : vector<128x128xf32> to vector<128xf32>
    %10 = vector.shape_cast %9 : vector<128xf32> to vector<1x128xf32>
    %11 = arith.mulf %6, %6 : vector<128x128xf32>
    %cst_10 = arith.constant dense<0.000000e+00> : vector<128xf32>
    %12 = vector.multi_reduction <add>, %11, %cst_10 [0] : vector<128x128xf32> to vector<128xf32>
    %13 = vector.shape_cast %12 : vector<128xf32> to vector<1x128xf32>
    %cst_11 = arith.constant 7.812500e-03 : f32
    %14 = vector.broadcast %cst_11 : f32 to vector<1x128xf32>
    %15 = arith.mulf %10, %14 : vector<1x128xf32>
    %cst_12 = arith.constant 7.812500e-03 : f32
    %16 = vector.broadcast %cst_12 : f32 to vector<1x128xf32>
    %17 = arith.mulf %13, %16 : vector<1x128xf32>
    %18 = arith.mulf %15, %15 : vector<1x128xf32>
    %19 = arith.subf %17, %18 : vector<1x128xf32>
    %cst_13 = arith.constant 0.000000e+00 : f32
    %20 = vector.broadcast %cst_13 : f32 to vector<1x128xf32>
    %21 = arith.maximumf %19, %20 : vector<1x128xf32>
    %cst_14 = arith.constant 9.99999974E-6 : f32
    %22 = vector.broadcast %cst_14 : f32 to vector<1x128xf32>
    %23 = arith.addf %21, %22 : vector<1x128xf32>
    %24 = math.rsqrt %23 : vector<1x128xf32>
    %25 = arith.mulf %7, %24 : vector<1x128xf32>
    %26 = arith.mulf %15, %25 : vector<1x128xf32>
    %27 = arith.subf %8, %26 : vector<1x128xf32>
    %28 = vector.broadcast %25 : vector<1x128xf32> to vector<128x128xf32>
    %29 = arith.mulf %6, %28 : vector<128x128xf32>
    %30 = vector.broadcast %27 : vector<1x128xf32> to vector<128x128xf32>
    %31 = arith.addf %29, %30 : vector<128x128xf32>
    %cst_15 = arith.constant 2.000000e-01 : f32
    %32 = vector.broadcast %cst_15 : f32 to vector<128x128xf32>
    %33 = arith.mulf %32, %31 : vector<128x128xf32>
    %34 = arith.maximumf %31, %33 : vector<128x128xf32>
    %c0_16 = arith.constant 0 : index
    %c0_17 = arith.constant 0 : index
    %35 = vector.load %arg6[%c0_16, %c0_17] : memref<128x64xbf16, #tpu.memory_space<vmem>>, vector<128x64xbf16>
    %36 = arith.truncf %34 : vector<128x128xf32> to vector<128x128xbf16>
    %cst_18 = arith.constant dense<0.000000e+00> : vector<128x64xf32>
    %37 = tpu.matmul %36, %35, %cst_18 {dimension_numbers = #tpu.dot_dimension_numbers<[1], [0], [0], [1], [0, 0, 1, 1], [], []>} : vector<128x128xbf16>, vector<128x64xbf16>, vector<128x64xf32> -> vector<128x64xf32>
    %c0_19 = arith.constant 0 : index
    %c0_20 = arith.constant 0 : index
    %38 = vector.load %arg7[%c0_19, %c0_20] : memref<1x64xf32, #tpu.memory_space<vmem>>, vector<1x64xf32>
    %39 = vector.broadcast %38 : vector<1x64xf32> to vector<128x64xf32>
    %40 = arith.addf %37, %39 : vector<128x64xf32>
    %c0_21 = arith.constant 0 : index
    %c0_22 = arith.constant 0 : index
    %41 = vector.load %arg8[%c0_21, %c0_22] : memref<1x64xf32, #tpu.memory_space<vmem>>, vector<1x64xf32>
    %c0_23 = arith.constant 0 : index
    %c0_24 = arith.constant 0 : index
    %42 = vector.load %arg9[%c0_23, %c0_24] : memref<1x64xf32, #tpu.memory_space<vmem>>, vector<1x64xf32>
    %cst_25 = arith.constant dense<0.000000e+00> : vector<64xf32>
    %43 = vector.multi_reduction <add>, %40, %cst_25 [0] : vector<128x64xf32> to vector<64xf32>
    %44 = vector.shape_cast %43 : vector<64xf32> to vector<1x64xf32>
    %45 = arith.mulf %40, %40 : vector<128x64xf32>
    %cst_26 = arith.constant dense<0.000000e+00> : vector<64xf32>
    %46 = vector.multi_reduction <add>, %45, %cst_26 [0] : vector<128x64xf32> to vector<64xf32>
    %47 = vector.shape_cast %46 : vector<64xf32> to vector<1x64xf32>
    %cst_27 = arith.constant 7.812500e-03 : f32
    %48 = vector.broadcast %cst_27 : f32 to vector<1x64xf32>
    %49 = arith.mulf %44, %48 : vector<1x64xf32>
    %cst_28 = arith.constant 7.812500e-03 : f32
    %50 = vector.broadcast %cst_28 : f32 to vector<1x64xf32>
    %51 = arith.mulf %47, %50 : vector<1x64xf32>
    %52 = arith.mulf %49, %49 : vector<1x64xf32>
    %53 = arith.subf %51, %52 : vector<1x64xf32>
    %cst_29 = arith.constant 0.000000e+00 : f32
    %54 = vector.broadcast %cst_29 : f32 to vector<1x64xf32>
    %55 = arith.maximumf %53, %54 : vector<1x64xf32>
    %cst_30 = arith.constant 9.99999974E-6 : f32
    %56 = vector.broadcast %cst_30 : f32 to vector<1x64xf32>
    %57 = arith.addf %55, %56 : vector<1x64xf32>
    %58 = math.rsqrt %57 : vector<1x64xf32>
    %59 = arith.mulf %41, %58 : vector<1x64xf32>
    %60 = arith.mulf %49, %59 : vector<1x64xf32>
    %61 = arith.subf %42, %60 : vector<1x64xf32>
    %62 = vector.broadcast %59 : vector<1x64xf32> to vector<128x64xf32>
    %63 = arith.mulf %40, %62 : vector<128x64xf32>
    %64 = vector.broadcast %61 : vector<1x64xf32> to vector<128x64xf32>
    %65 = arith.addf %63, %64 : vector<128x64xf32>
    %cst_31 = arith.constant 2.000000e-01 : f32
    %66 = vector.broadcast %cst_31 : f32 to vector<128x64xf32>
    %67 = arith.mulf %66, %65 : vector<128x64xf32>
    %68 = arith.maximumf %65, %67 : vector<128x64xf32>
    %c0_32 = arith.constant 0 : index
    %c0_33 = arith.constant 0 : index
    %69 = vector.load %arg10[%c0_32, %c0_33] : memref<64x128xbf16, #tpu.memory_space<vmem>>, vector<64x128xbf16>
    %70 = arith.truncf %68 : vector<128x64xf32> to vector<128x64xbf16>
    %cst_34 = arith.constant dense<0.000000e+00> : vector<128x128xf32>
    %71 = tpu.matmul %70, %69, %cst_34 {dimension_numbers = #tpu.dot_dimension_numbers<[1], [0], [0], [1], [0, 0, 1, 1], [], []>} : vector<128x64xbf16>, vector<64x128xbf16>, vector<128x128xf32> -> vector<128x128xf32>
    %c0_35 = arith.constant 0 : index
    %c0_36 = arith.constant 0 : index
    %72 = vector.load %arg11[%c0_35, %c0_36] : memref<1x128xf32, #tpu.memory_space<vmem>>, vector<1x128xf32>
    %73 = vector.broadcast %72 : vector<1x128xf32> to vector<128x128xf32>
    %74 = arith.addf %71, %73 : vector<128x128xf32>
    %75 = vector.extract_strided_slice %74 {offsets = [0, 0], sizes = [128, 64], strides = [1, 1]} : vector<128x128xf32> to vector<128x64xf32>
    %76 = vector.extract_strided_slice %74 {offsets = [0, 64], sizes = [128, 64], strides = [1, 1]} : vector<128x128xf32> to vector<128x64xf32>
    %cst_37 = arith.constant 5.000000e-01 : f32
    %77 = vector.broadcast %cst_37 : f32 to vector<128x64xf32>
    %78 = arith.mulf %77, %76 : vector<128x64xf32>
    %79 = math.exp %78 : vector<128x64xf32>
    %c0_38 = arith.constant 0 : index
    %c0_39 = arith.constant 0 : index
    %80 = vector.load %arg1[%c0_38, %c0_39] : memref<128x64xf32, #tpu.memory_space<vmem>>, vector<128x64xf32>
    %81 = arith.mulf %79, %80 : vector<128x64xf32>
    %82 = arith.addf %75, %81 : vector<128x64xf32>
    %c0_40 = arith.constant 0 : index
    %c0_41 = arith.constant 0 : index
    %83 = vector.load %arg12[%c0_40, %c0_41] : memref<64x64xbf16, #tpu.memory_space<vmem>>, vector<64x64xbf16>
    %84 = arith.truncf %82 : vector<128x64xf32> to vector<128x64xbf16>
    %cst_42 = arith.constant dense<0.000000e+00> : vector<128x64xf32>
    %85 = tpu.matmul %84, %83, %cst_42 {dimension_numbers = #tpu.dot_dimension_numbers<[1], [0], [0], [1], [0, 0, 1, 1], [], []>} : vector<128x64xbf16>, vector<64x64xbf16>, vector<128x64xf32> -> vector<128x64xf32>
    %c0_43 = arith.constant 0 : index
    %c0_44 = arith.constant 0 : index
    %86 = vector.load %arg13[%c0_43, %c0_44] : memref<1x64xf32, #tpu.memory_space<vmem>>, vector<1x64xf32>
    %87 = vector.broadcast %86 : vector<1x64xf32> to vector<128x64xf32>
    %88 = arith.addf %85, %87 : vector<128x64xf32>
    %c0_45 = arith.constant 0 : index
    %c0_46 = arith.constant 0 : index
    %89 = vector.load %arg14[%c0_45, %c0_46] : memref<1x64xf32, #tpu.memory_space<vmem>>, vector<1x64xf32>
    %c0_47 = arith.constant 0 : index
    %c0_48 = arith.constant 0 : index
    %90 = vector.load %arg15[%c0_47, %c0_48] : memref<1x64xf32, #tpu.memory_space<vmem>>, vector<1x64xf32>
    %cst_49 = arith.constant dense<0.000000e+00> : vector<64xf32>
    %91 = vector.multi_reduction <add>, %88, %cst_49 [0] : vector<128x64xf32> to vector<64xf32>
    %92 = vector.shape_cast %91 : vector<64xf32> to vector<1x64xf32>
    %93 = arith.mulf %88, %88 : vector<128x64xf32>
    %cst_50 = arith.constant dense<0.000000e+00> : vector<64xf32>
    %94 = vector.multi_reduction <add>, %93, %cst_50 [0] : vector<128x64xf32> to vector<64xf32>
    %95 = vector.shape_cast %94 : vector<64xf32> to vector<1x64xf32>
    %cst_51 = arith.constant 7.812500e-03 : f32
    %96 = vector.broadcast %cst_51 : f32 to vector<1x64xf32>
    %97 = arith.mulf %92, %96 : vector<1x64xf32>
    %cst_52 = arith.constant 7.812500e-03 : f32
    %98 = vector.broadcast %cst_52 : f32 to vector<1x64xf32>
    %99 = arith.mulf %95, %98 : vector<1x64xf32>
    %100 = arith.mulf %97, %97 : vector<1x64xf32>
    %101 = arith.subf %99, %100 : vector<1x64xf32>
    %cst_53 = arith.constant 0.000000e+00 : f32
    %102 = vector.broadcast %cst_53 : f32 to vector<1x64xf32>
    %103 = arith.maximumf %101, %102 : vector<1x64xf32>
    %cst_54 = arith.constant 9.99999974E-6 : f32
    %104 = vector.broadcast %cst_54 : f32 to vector<1x64xf32>
    %105 = arith.addf %103, %104 : vector<1x64xf32>
    %106 = math.rsqrt %105 : vector<1x64xf32>
    %107 = arith.mulf %89, %106 : vector<1x64xf32>
    %108 = arith.mulf %97, %107 : vector<1x64xf32>
    %109 = arith.subf %90, %108 : vector<1x64xf32>
    %110 = vector.broadcast %107 : vector<1x64xf32> to vector<128x64xf32>
    %111 = arith.mulf %88, %110 : vector<128x64xf32>
    %112 = vector.broadcast %109 : vector<1x64xf32> to vector<128x64xf32>
    %113 = arith.addf %111, %112 : vector<128x64xf32>
    %cst_55 = arith.constant 2.000000e-01 : f32
    %114 = vector.broadcast %cst_55 : f32 to vector<128x64xf32>
    %115 = arith.mulf %114, %113 : vector<128x64xf32>
    %116 = arith.maximumf %113, %115 : vector<128x64xf32>
    %c0_56 = arith.constant 0 : index
    %c0_57 = arith.constant 0 : index
    %117 = vector.load %arg16[%c0_56, %c0_57] : memref<64x128xbf16, #tpu.memory_space<vmem>>, vector<64x128xbf16>
    %118 = arith.truncf %116 : vector<128x64xf32> to vector<128x64xbf16>
    %cst_58 = arith.constant dense<0.000000e+00> : vector<128x128xf32>
    %119 = tpu.matmul %118, %117, %cst_58 {dimension_numbers = #tpu.dot_dimension_numbers<[1], [0], [0], [1], [0, 0, 1, 1], [], []>} : vector<128x64xbf16>, vector<64x128xbf16>, vector<128x128xf32> -> vector<128x128xf32>
    %c0_59 = arith.constant 0 : index
    %c0_60 = arith.constant 0 : index
    %120 = vector.load %arg17[%c0_59, %c0_60] : memref<1x128xf32, #tpu.memory_space<vmem>>, vector<1x128xf32>
    %121 = vector.broadcast %120 : vector<1x128xf32> to vector<128x128xf32>
    %122 = arith.addf %119, %121 : vector<128x128xf32>
    %c0_61 = arith.constant 0 : index
    %c0_62 = arith.constant 0 : index
    %123 = vector.load %arg18[%c0_61, %c0_62] : memref<1x128xf32, #tpu.memory_space<vmem>>, vector<1x128xf32>
    %c0_63 = arith.constant 0 : index
    %c0_64 = arith.constant 0 : index
    %124 = vector.load %arg19[%c0_63, %c0_64] : memref<1x128xf32, #tpu.memory_space<vmem>>, vector<1x128xf32>
    %cst_65 = arith.constant dense<0.000000e+00> : vector<128xf32>
    %125 = vector.multi_reduction <add>, %122, %cst_65 [0] : vector<128x128xf32> to vector<128xf32>
    %126 = vector.shape_cast %125 : vector<128xf32> to vector<1x128xf32>
    %127 = arith.mulf %122, %122 : vector<128x128xf32>
    %cst_66 = arith.constant dense<0.000000e+00> : vector<128xf32>
    %128 = vector.multi_reduction <add>, %127, %cst_66 [0] : vector<128x128xf32> to vector<128xf32>
    %129 = vector.shape_cast %128 : vector<128xf32> to vector<1x128xf32>
    %cst_67 = arith.constant 7.812500e-03 : f32
    %130 = vector.broadcast %cst_67 : f32 to vector<1x128xf32>
    %131 = arith.mulf %126, %130 : vector<1x128xf32>
    %cst_68 = arith.constant 7.812500e-03 : f32
    %132 = vector.broadcast %cst_68 : f32 to vector<1x128xf32>
    %133 = arith.mulf %129, %132 : vector<1x128xf32>
    %134 = arith.mulf %131, %131 : vector<1x128xf32>
    %135 = arith.subf %133, %134 : vector<1x128xf32>
    %cst_69 = arith.constant 0.000000e+00 : f32
    %136 = vector.broadcast %cst_69 : f32 to vector<1x128xf32>
    %137 = arith.maximumf %135, %136 : vector<1x128xf32>
    %cst_70 = arith.constant 9.99999974E-6 : f32
    %138 = vector.broadcast %cst_70 : f32 to vector<1x128xf32>
    %139 = arith.addf %137, %138 : vector<1x128xf32>
    %140 = math.rsqrt %139 : vector<1x128xf32>
    %141 = arith.mulf %123, %140 : vector<1x128xf32>
    %142 = arith.mulf %131, %141 : vector<1x128xf32>
    %143 = arith.subf %124, %142 : vector<1x128xf32>
    %144 = vector.broadcast %141 : vector<1x128xf32> to vector<128x128xf32>
    %145 = arith.mulf %122, %144 : vector<128x128xf32>
    %146 = vector.broadcast %143 : vector<1x128xf32> to vector<128x128xf32>
    %147 = arith.addf %145, %146 : vector<128x128xf32>
    %cst_71 = arith.constant 2.000000e-01 : f32
    %148 = vector.broadcast %cst_71 : f32 to vector<128x128xf32>
    %149 = arith.mulf %148, %147 : vector<128x128xf32>
    %150 = arith.maximumf %147, %149 : vector<128x128xf32>
    %c0_72 = arith.constant 0 : index
    %c0_73 = arith.constant 0 : index
    %151 = vector.load %arg20[%c0_72, %c0_73] : memref<128x256xbf16, #tpu.memory_space<vmem>>, vector<128x256xbf16>
    %152 = arith.truncf %150 : vector<128x128xf32> to vector<128x128xbf16>
    %cst_74 = arith.constant dense<0.000000e+00> : vector<128x256xf32>
    %153 = tpu.matmul %152, %151, %cst_74 {dimension_numbers = #tpu.dot_dimension_numbers<[1], [0], [0], [1], [0, 0, 1, 1], [], []>} : vector<128x128xbf16>, vector<128x256xbf16>, vector<128x256xf32> -> vector<128x256xf32>
    %c0_75 = arith.constant 0 : index
    %c0_76 = arith.constant 0 : index
    %154 = vector.load %arg21[%c0_75, %c0_76] : memref<1x256xf32, #tpu.memory_space<vmem>>, vector<1x256xf32>
    %155 = vector.broadcast %154 : vector<1x256xf32> to vector<128x256xf32>
    %156 = arith.addf %153, %155 : vector<128x256xf32>
    %157 = math.tanh %156 : vector<128x256xf32>
    %c0_77 = arith.constant 0 : index
    %c0_78 = arith.constant 0 : index
    %158 = vector.load %arg22[%c0_77, %c0_78] : memref<128x256xf32, #tpu.memory_space<vmem>>, vector<128x256xf32>
    tpu.vector_store %arg22[%c0_77, %c0_78], %157 {strides = array<i32>} : memref<128x256xf32, #tpu.memory_space<vmem>>, vector<128x256xf32>,
    %c0_79 = arith.constant 0 : index
    %c0_80 = arith.constant 0 : index
    %159 = vector.load %arg23[%c0_79, %c0_80] : memref<128x128xf32, #tpu.memory_space<vmem>>, vector<128x128xf32>
    tpu.vector_store %arg23[%c0_79, %c0_80], %74 {strides = array<i32>} : memref<128x128xf32, #tpu.memory_space<vmem>>, vector<128x128xf32>,
    return
  }
}

</mosaic_0001>

<bundles_post_ra>
// kernel: vae_forward_packed.1
= control target key start
LH: loop header
LB: loop body
LE: loop exit
PB: predicated region body
PF: predicated region fallthrough
CT: control target
= control target key end

     0   :  { %s4636_s0 = inlined_call_operand.vmem [shape: f32[128,256], index: 0, kind: input, shape index: {}]   ;;  %s4637_s1 = inlined_call_operand.vmem [shape: f32[128,64], index: 1, kind: input, shape index: {}]   ;;  %s4638_s2 = inlined_call_operand.hbm [shape: bf16[256,128], index: 2, kind: input, shape index: {}]   ;;  %s4639_s3 = inlined_call_operand.hbm [shape: f32[1,128], index: 3, kind: input, shape index: {}]   ;;  %s4640_s4 = inlined_call_operand.hbm [shape: f32[1,128], index: 4, kind: input, shape index: {}]   ;;  %s4641_s5 = inlined_call_operand.hbm [shape: f32[1,128], index: 5, kind: input, shape index: {}]   ;;  %s4642_s6 = inlined_call_operand.vmem [shape: bf16[128,64], index: 6, kind: input, shape index: {}]   ;;  %s4643_s7 = inlined_call_operand.hbm [shape: f32[1,64], index: 7, kind: input, shape index: {}]   ;;  %s4644_s8 = inlined_call_operand.hbm [shape: f32[1,64], index: 8, kind: input, shape index: {}]   ;;  %s4645_s9 = inlined_call_operand.hbm [shape: f32[1,64], index: 9, kind: input, shape index: {}]   ;;  %s4646_s10 = inlined_call_operand.vmem [shape: bf16[64,128], index: 10, kind: input, shape index: {}]   ;;  %s4647_s11 = inlined_call_operand.hbm [shape: f32[1,128], index: 11, kind: input, shape index: {}]   ;;  %s4648_s12 = inlined_call_operand.vmem [shape: bf16[64,64], index: 12, kind: input, shape index: {}]   ;;  %s4649_s13 = inlined_call_operand.hbm [shape: f32[1,64], index: 13, kind: input, shape index: {}]   ;;  %s4650_s14 = inlined_call_operand.hbm [shape: f32[1,64], index: 14, kind: input, shape index: {}]   ;;  %s4651_s15 = inlined_call_operand.hbm [shape: f32[1,64], index: 15, kind: input, shape index: {}]   ;;  %s4652_s16 = inlined_call_operand.hbm [shape: bf16[64,128], index: 16, kind: input, shape index: {}]   ;;  %s4653_s17 = inlined_call_operand.hbm [shape: f32[1,128], index: 17, kind: input, shape index: {}]   ;;  %s4654_s18 = inlined_call_operand.hbm [shape: f32[1,128], index: 18, kind: input, shape index: {}]   ;;  %s4655_s19 = inlined_call_operand.hbm [shape: f32[1,128], index: 19, kind: input, shape index: {}]   ;;  %s4656_s20 = inlined_call_operand.hbm [shape: bf16[128,256], index: 20, kind: input, shape index: {}]   ;;  %s4657_s21 = inlined_call_operand.hbm [shape: f32[1,256], index: 21, kind: input, shape index: {}]   ;;  %s4658_s22 = inlined_call_operand.hbm [shape: f32[128,256], index: 22, kind: output, shape index: {0}]   ;;  %s4659_s23 = inlined_call_operand.hbm [shape: f32[128,128], index: 23, kind: output, shape index: {1}]  }
   0x1   :  { %4663 = sst [smem:[#allocation43_spill]] %s4636_s0 }
   0x2   :  { %4664 = sst [smem:[#allocation44_spill]] %s4637_s1 }
   0x3   :  { %4665 = sst [smem:[#allocation45_spill]] %s4638_s2 }
   0x4   :  { %4666 = sst [smem:[#allocation46_spill]] %s4639_s3 }
   0x5   :  { %4667 = sst [smem:[#allocation47_spill]] %s4640_s4 }
   0x6   :  { %4668 = sst [smem:[#allocation48_spill]] %s4641_s5 }
   0x7   :  { %4669 = sst [smem:[#allocation49_spill]] %s4642_s6 }
   0x8   :  { %4670 = sst [smem:[#allocation50_spill]] %s4643_s7 }
   0x9   :  { %29 = vsyncpa [#allocation3], 0 }
   0xa   :  { %30 = vsyncpa [#allocation6], 0 }
   0xb   :  { %31 = vsyncpa [#allocation9], 0 }
   0xc   :  { %32 = vsyncpa [#allocation12], 0 }
   0xd   :  { %33 = vsyncpa [#allocation15], 0 }
   0xe   :  { %34 = vsyncpa [#allocation18], 0 }
   0xf   :  { %35 = vsyncpa [#allocation21], 0 }
  0x10   :  { %36 = vsyncpa [#allocation24], 0 }
  0x11   :  { %37 = vsyncpa [#allocation27], 0 }
  0x12   :  { %38 = vsyncpa [#allocation4], 0 }
  0x13   :  { %39 = vsyncpa [#allocation31], 0  ;;  %s3370_s4 = smov [#allocation5]   ;;  %s3371_s24 = smov [#allocation8]  }
  0x14   :  { %s62_s30 = sshll.u32 %s3370_s4, 4  ;;  %s82_s25 = sshll.u32 %s3371_s24, 4  ;;  %s63_s30 = int_to_ptr.vmem [resolvable:$true] %s62_s30  ;;  %s83_s25 = int_to_ptr.vmem [resolvable:$true] %s82_s25 }
  0x15   :  { %s2976_s5 = scalar_lea.vmem %s63_s30, 16  ;;  %s2980_s1 = scalar_lea.vmem %s63_s30, 32 }
  0x16   :  { %p2977_p0 = scmp.ne.s32.totalorder %s63_s30, %s2976_s5  ;;  %p2981_p1 = scmp.lt.s32.totalorder %s63_s30, %s63_s30 }
  0x17   :  { %p2982_p2 = scmp.lt.s32.totalorder %s2980_s1, %s2976_s5 }
  0x19   :  { %p2983_p3 = por %p2982_p2, %p2981_p1 }
  0x1b   :  { %p2984_p4 = pnand %p2983_p3, %p2977_p0 }
  0x1d   :  { %2987 = shalt.err (!%p2984_p4)
}
  0x1e   :  { %s4671_s6 = sld [smem:[#allocation46_spill]]  ;;  %s2996_s27 = scalar_lea.vmem %s83_s25, 16 }
  0x1f   :  { %p2997_p5 = scmp.ne.s32.totalorder %s83_s25, %s2996_s27  ;;  %s3000_s7 = scalar_lea.vmem %s83_s25, 32 }
  0x20   :  { %p3001_p6 = scmp.lt.s32.totalorder %s83_s25, %s83_s25  ;;  %p3002_p7 = scmp.lt.s32.totalorder %s3000_s7, %s2996_s27 }
  0x22   :  { %p3003_p8 = por %p3002_p7, %p3001_p6 }
  0x24   :  { %65 = dma.hbm_to_vmem [thread:$0]  %s4671_s6, 16, %s63_s30, [#allocation6]  }
  0x25   :  { %p3004_p9 = pnand %p3003_p8, %p2997_p5 }
  0x27   :  { %3007 = shalt.err (!%p3004_p9)
}
  0x28   :  { %s4672_s3 = sld [smem:[#allocation48_spill]]  ;;  %s3372_s0 = smov [#allocation11]  }
  0x29   :  { %s104_s4 = sshll.u32 %s3372_s0, 4  ;;  %s3373_s24 = smov [#allocation14]   ;;  %s105_s4 = int_to_ptr.vmem [resolvable:$true] %s104_s4 }
  0x2a   :  { %s126_s5 = sshll.u32 %s3373_s24, 4  ;;  %s3016_s1 = scalar_lea.vmem %s105_s4, 16  ;;  %s127_s5 = int_to_ptr.vmem [resolvable:$true] %s126_s5 }
  0x2b   :  { %p3017_p10 = scmp.ne.s32.totalorder %s105_s4, %s3016_s1  ;;  %s3020_s30 = scalar_lea.vmem %s105_s4, 32 }
  0x2c   :  { %p3021_p11 = scmp.lt.s32.totalorder %s105_s4, %s105_s4  ;;  %p3022_p12 = scmp.lt.s32.totalorder %s3020_s30, %s3016_s1 }
  0x2e   :  { %85 = dma.hbm_to_vmem [thread:$0]  %s4672_s3, 16, %s83_s25, [#allocation9]  }
  0x2f   :  { %p3023_p13 = por %p3022_p12, %p3021_p11 }
  0x31   :  { %p3024_p0 = pnand %p3023_p13, %p3017_p10 }
  0x33   :  { %3027 = shalt.err (!%p3024_p0)
}
  0x34   :  { %107 = dma.hbm_to_vmem [thread:$0]  %s4644_s8, 16, %s105_s4, [#allocation12]  }
  0x35   :  { %s3036_s6 = scalar_lea.vmem %s127_s5, 16  ;;  %s3040_s25 = scalar_lea.vmem %s127_s5, 32 }
  0x36   :  { %p3037_p1 = scmp.ne.s32.totalorder %s127_s5, %s3036_s6  ;;  %p3041_p2 = scmp.lt.s32.totalorder %s127_s5, %s127_s5 }
  0x37   :  { %p3042_p3 = scmp.lt.s32.totalorder %s3040_s25, %s3036_s6 }
  0x39   :  { %p3043_p4 = por %p3042_p3, %p3041_p2 }
  0x3b   :  { %p3044_p5 = pnand %p3043_p4, %p3037_p1 }
  0x3d   :  { %3047 = shalt.err (!%p3044_p5)
}
  0x3e   :  { %129 = dma.hbm_to_vmem [thread:$0]  %s4647_s11, 16, %s127_s5, [#allocation15]  }
  0x3f   :  { %s3374_s28 = smov [#allocation17]  }
  0x40   :  { %s148_s29 = sshll.u32 %s3374_s28, 4  ;;  %s149_s29 = int_to_ptr.vmem [resolvable:$true] %s148_s29 }
  0x41   :  { %s3056_s3 = scalar_lea.vmem %s149_s29, 16  ;;  %s3060_s0 = scalar_lea.vmem %s149_s29, 32 }
  0x42   :  { %p3057_p6 = scmp.ne.s32.totalorder %s149_s29, %s3056_s3  ;;  %p3061_p7 = scmp.lt.s32.totalorder %s149_s29, %s149_s29 }
  0x43   :  { %p3062_p8 = scmp.lt.s32.totalorder %s3060_s0, %s3056_s3 }
  0x45   :  { %p3063_p9 = por %p3062_p8, %p3061_p7 }
  0x47   :  { %p3064_p10 = pnand %p3063_p9, %p3057_p6 }
  0x49   :  { %3067 = shalt.err (!%p3064_p10)
}
  0x4a   :  { %151 = dma.hbm_to_vmem [thread:$0]  %s4650_s14, 16, %s149_s29, [#allocation18]  }
  0x4b   :  { %s3375_s24 = smov [#allocation20]   ;;  %s3376_s30 = smov [#allocation23]  }
  0x4c   :  { %s167_s1 = sshll.u32 %s3375_s24, 4  ;;  %s190_s11 = sshll.u32 %s3376_s30, 4  ;;  %s168_s1 = int_to_ptr.vmem [resolvable:$true] %s167_s1  ;;  %s191_s11 = int_to_ptr.vmem [resolvable:$true] %s190_s11 }
  0x4d   :  { %s3076_s5 = scalar_lea.vmem %s168_s1, 512  ;;  %p3081_p12 = scmp.lt.s32.totalorder %s168_s1, %s168_s1 }
  0x4e   :  { %p3077_p11 = scmp.ne.s32.totalorder %s168_s1, %s3076_s5  ;;  %p3082_p13 = scmp.lt.s32.totalorder %s3076_s5, %s3076_s5 }
  0x50   :  { %p3083_p0 = por %p3082_p13, %p3081_p12 }
  0x52   :  { %p3084_p1 = pnand %p3083_p0, %p3077_p11 }
  0x54   :  { %3087 = shalt.err (!%p3084_p1)
}
  0x55   :  { %s3377_s26 = smov 64   ;;  %s3378_s2 = smov 4  }
  0x56   :  { %173 = dma.hbm_to_vmem [thread:$0]  %s4652_s16, 512, %s168_s1, [#allocation21], %s3377_s26, %s3377_s26, %s3378_s2  }
  0x57   :  { %s3096_s14 = scalar_lea.vmem %s191_s11, 16  ;;  %s3100_s27 = scalar_lea.vmem %s191_s11, 32 }
  0x58   :  { %p3097_p2 = scmp.ne.s32.totalorder %s191_s11, %s3096_s14  ;;  %p3101_p3 = scmp.lt.s32.totalorder %s191_s11, %s191_s11 }
  0x59   :  { %p3102_p4 = scmp.lt.s32.totalorder %s3100_s27, %s3096_s14 }
  0x5b   :  { %p3103_p5 = por %p3102_p4, %p3101_p3 }
  0x5d   :  { %p3104_p6 = pnand %p3103_p5, %p3097_p2 }
  0x5f   :  { %3107 = shalt.err (!%p3104_p6)
}
  0x60   :  { %193 = dma.hbm_to_vmem [thread:$0]  %s4654_s18, 16, %s191_s11, [#allocation24]  }
  0x61   :  { %s3379_s29 = smov [#allocation26]  }
  0x62   :  { %s209_s3 = sshll.u32 %s3379_s29, 4  ;;  %s210_s3 = int_to_ptr.vmem [resolvable:$true] %s209_s3 }
  0x63   :  { %s3116_s0 = scalar_lea.vmem %s210_s3, 2048  ;;  %p3121_p8 = scmp.lt.s32.totalorder %s210_s3, %s210_s3 }
  0x64   :  { %p3117_p7 = scmp.ne.s32.totalorder %s210_s3, %s3116_s0  ;;  %p3122_p9 = scmp.lt.s32.totalorder %s3116_s0, %s3116_s0 }
  0x66   :  { %p3123_p10 = por %p3122_p9, %p3121_p8 }
  0x68   :  { %p3124_p11 = pnand %p3123_p10, %p3117_p7 }
  0x6a   :  { %3127 = shalt.err (!%p3124_p11)
}
  0x6b   :  { %s3380_s16 = smov 128   ;;  %s3381_s8 = smov 8  }
  0x6c   :  { %215 = dma.hbm_to_vmem [thread:$0]  %s4656_s20, 2048, %s210_s3, [#allocation27], %s3380_s16, %s3380_s16, %s3381_s8  }
  0x6d   :  { %s3382_s18 = smov [#allocation2]   ;;  %s3383_s30 = smov [#allocation7]  }
  0x6e   :  { %s49_s1 = sshll.u32 %s3382_s18, 4  ;;  %s72_s11 = sshll.u32 %s3383_s30, 4  ;;  %s50_s1 = int_to_ptr.vmem [resolvable:$true] %s49_s1  ;;  %s73_s11 = int_to_ptr.vmem [resolvable:$true] %s72_s11 }
  0x6f   :  { %s3136_s5 = scalar_lea.vmem %s50_s1, 2048  ;;  %p3141_p13 = scmp.lt.s32.totalorder %s50_s1, %s50_s1 }
  0x70   :  { %p3137_p12 = scmp.ne.s32.totalorder %s50_s1, %s3136_s5  ;;  %p3142_p0 = scmp.lt.s32.totalorder %s3136_s5, %s3136_s5 }
  0x72   :  { %p3143_p1 = por %p3142_p0, %p3141_p13 }
  0x74   :  { %p3144_p2 = pnand %p3143_p1, %p3137_p12 }
  0x76   :  { %3147 = shalt.err (!%p3144_p2)
}
  0x77   :  { %s4673_s14 = sld [smem:[#allocation45_spill]]  ;;  %s3156_s20 = scalar_lea.vmem %s73_s11, 16 }
  0x78   :  { %p3157_p3 = scmp.ne.s32.totalorder %s73_s11, %s3156_s20  ;;  %s3160_s27 = scalar_lea.vmem %s73_s11, 32 }
  0x79   :  { %p3161_p4 = scmp.lt.s32.totalorder %s73_s11, %s73_s11  ;;  %p3162_p5 = scmp.lt.s32.totalorder %s3160_s27, %s3156_s20 }
  0x7b   :  { %p3163_p6 = por %p3162_p5, %p3161_p4 }
  0x7d   :  { %55 = dma.hbm_to_vmem [thread:$0]  %s4673_s14, 2048, %s50_s1, [#allocation3], %s3377_s26, %s3377_s26, %s3378_s2  }
  0x7e   :  { %p3164_p7 = pnand %p3163_p6, %p3157_p3 }
  0x80   :  { %3167 = shalt.err (!%p3164_p7)
}
  0x81   :  { %s4674_s29 = sld [smem:[#allocation47_spill]]  ;;  %s3384_s3 = smov [#allocation10]  }
  0x82   :  { %s94_s0 = sshll.u32 %s3384_s3, 4  ;;  %s3385_s4 = smov [#allocation13]   ;;  %s95_s0 = int_to_ptr.vmem [resolvable:$true] %s94_s0 }
  0x83   :  { %s114_s24 = sshll.u32 %s3385_s4, 4  ;;  %s3176_s18 = scalar_lea.vmem %s95_s0, 16  ;;  %s115_s24 = int_to_ptr.vmem [resolvable:$true] %s114_s24 }
  0x84   :  { %p3177_p8 = scmp.ne.s32.totalorder %s95_s0, %s3176_s18  ;;  %s3180_s2 = scalar_lea.vmem %s95_s0, 32 }
  0x85   :  { %p3181_p9 = scmp.lt.s32.totalorder %s95_s0, %s95_s0  ;;  %p3182_p10 = scmp.lt.s32.totalorder %s3180_s2, %s3176_s18 }
  0x87   :  { %75 = dma.hbm_to_vmem [thread:$0]  %s4674_s29, 16, %s73_s11, [#allocation6]  }
  0x88   :  { %p3183_p11 = por %p3182_p10, %p3181_p9 }
  0x8a   :  { %p3184_p12 = pnand %p3183_p11, %p3177_p8 }
  0x8c   :  { %3187 = shalt.err (!%p3184_p12)
}
  0x8d   :  { %s4675_s5 = sld [smem:[#allocation50_spill]]  ;;  %s3196_s6 = scalar_lea.vmem %s115_s24, 16 }
  0x8e   :  { %p3197_p13 = scmp.ne.s32.totalorder %s115_s24, %s3196_s6  ;;  %s3200_s11 = scalar_lea.vmem %s115_s24, 32 }
  0x8f   :  { %p3201_p0 = scmp.lt.s32.totalorder %s115_s24, %s115_s24  ;;  %p3202_p1 = scmp.lt.s32.totalorder %s3200_s11, %s3196_s6 }
  0x91   :  { %p3203_p2 = por %p3202_p1, %p3201_p0 }
  0x93   :  { %97 = dma.hbm_to_vmem [thread:$0]  %s4675_s5, 16, %s95_s0, [#allocation9]  }
  0x94   :  { %p3204_p3 = pnand %p3203_p2, %p3197_p13 }
  0x96   :  { %3207 = shalt.err (!%p3204_p3)
}
  0x97   :  { %117 = dma.hbm_to_vmem [thread:$0]  %s4645_s9, 16, %s115_s24, [#allocation12]  }
  0x98   :  { %s3386_s20 = smov [#allocation16]   ;;  %s3387_s7 = smov [#allocation19]  }
  0x99   :  { %s138_s27 = sshll.u32 %s3386_s20, 4  ;;  %s158_s28 = sshll.u32 %s3387_s7, 4  ;;  %s139_s27 = int_to_ptr.vmem [resolvable:$true] %s138_s27  ;;  %s159_s28 = int_to_ptr.vmem [resolvable:$true] %s158_s28 }
  0x9a   :  { %s3216_s29 = scalar_lea.vmem %s139_s27, 16  ;;  %s3220_s3 = scalar_lea.vmem %s139_s27, 32 }
  0x9b   :  { %p3217_p4 = scmp.ne.s32.totalorder %s139_s27, %s3216_s29  ;;  %p3221_p5 = scmp.lt.s32.totalorder %s139_s27, %s139_s27 }
  0x9c   :  { %p3222_p6 = scmp.lt.s32.totalorder %s3220_s3, %s3216_s29 }
  0x9e   :  { %p3223_p7 = por %p3222_p6, %p3221_p5 }
  0xa0   :  { %p3224_p8 = pnand %p3223_p7, %p3217_p4 }
  0xa2   :  { %3227 = shalt.err (!%p3224_p8)
}
  0xa3   :  { %141 = dma.hbm_to_vmem [thread:$0]  %s4649_s13, 16, %s139_s27, [#allocation15]  }
  0xa4   :  { %s3236_s18 = scalar_lea.vmem %s159_s28, 16  ;;  %s3240_s9 = scalar_lea.vmem %s159_s28, 32 }
  0xa5   :  { %p3237_p9 = scmp.ne.s32.totalorder %s159_s28, %s3236_s18  ;;  %p3241_p10 = scmp.lt.s32.totalorder %s159_s28, %s159_s28 }
  0xa6   :  { %p3242_p11 = scmp.lt.s32.totalorder %s3240_s9, %s3236_s18 }
  0xa8   :  { %p3243_p12 = por %p3242_p11, %p3241_p10 }
  0xaa   :  { %p3244_p13 = pnand %p3243_p12, %p3237_p9 }
  0xac   :  { %3247 = shalt.err (!%p3244_p13)
}
  0xad   :  { %161 = dma.hbm_to_vmem [thread:$0]  %s4651_s15, 16, %s159_s28, [#allocation18]  }
  0xae   :  { %s3388_s1 = smov [#allocation22]   ;;  %s3389_s5 = smov [#allocation25]  }
  0xaf   :  { %s180_s30 = sshll.u32 %s3388_s1, 4  ;;  %s200_s6 = sshll.u32 %s3389_s5, 4  ;;  %s181_s30 = int_to_ptr.vmem [resolvable:$true] %s180_s30  ;;  %s201_s6 = int_to_ptr.vmem [resolvable:$true] %s200_s6 }
  0xb0   :  { %s3256_s11 = scalar_lea.vmem %s181_s30, 16  ;;  %s3260_s13 = scalar_lea.vmem %s181_s30, 32 }
  0xb1   :  { %p3257_p0 = scmp.ne.s32.totalorder %s181_s30, %s3256_s11  ;;  %p3261_p1 = scmp.lt.s32.totalorder %s181_s30, %s181_s30 }
  0xb2   :  { %p3262_p2 = scmp.lt.s32.totalorder %s3260_s13, %s3256_s11 }
  0xb4   :  { %p3263_p3 = por %p3262_p2, %p3261_p1 }
  0xb6   :  { %p3264_p4 = pnand %p3263_p3, %p3257_p0 }
  0xb8   :  { %3267 = shalt.err (!%p3264_p4)
}
  0xb9   :  { %183 = dma.hbm_to_vmem [thread:$0]  %s4653_s17, 16, %s181_s30, [#allocation21]  }
  0xba   :  { %s3276_s20 = scalar_lea.vmem %s201_s6, 16  ;;  %s3280_s15 = scalar_lea.vmem %s201_s6, 32 }
  0xbb   :  { %p3277_p5 = scmp.ne.s32.totalorder %s201_s6, %s3276_s20  ;;  %p3281_p6 = scmp.lt.s32.totalorder %s201_s6, %s201_s6 }
  0xbc   :  { %p3282_p7 = scmp.lt.s32.totalorder %s3280_s15, %s3276_s20 }
  0xbe   :  { %p3283_p8 = por %p3282_p7, %p3281_p6 }
  0xc0   :  { %p3284_p9 = pnand %p3283_p8, %p3277_p5 }
  0xc2   :  { %3287 = shalt.err (!%p3284_p9)
}
  0xc3   :  { %203 = dma.hbm_to_vmem [thread:$0]  %s4655_s19, 16, %s201_s6, [#allocation24]  }
  0xc4   :  { %s3390_s28 = smov [#allocation28]  }
  0xc5   :  { %s222_s29 = sshll.u32 %s3390_s28, 4  ;;  %s223_s29 = int_to_ptr.vmem [resolvable:$true] %s222_s29 }
  0xc6   :  { %s3296_s3 = scalar_lea.vmem %s223_s29, 32  ;;  %p3301_p11 = scmp.lt.s32.totalorder %s223_s29, %s223_s29 }
  0xc7   :  { %p3297_p10 = scmp.ne.s32.totalorder %s223_s29, %s3296_s3  ;;  %p3302_p12 = scmp.lt.s32.totalorder %s3296_s3, %s3296_s3 }
  0xc9   :  { %p3303_p13 = por %p3302_p12, %p3301_p11 }
  0xcb   :  { %p3304_p0 = pnand %p3303_p13, %p3297_p10 }
  0xcd   :  { %3307 = shalt.err (!%p3304_p0)
}
  0xce   :  { %225 = dma.hbm_to_vmem [thread:$0]  %s4657_s21, 32, %s223_s29, [#allocation27]  }
  0xcf   :  { %3348 = dma.done.wait [#allocation3], 2048  }
  0xd0   :  { %3349 = vsyncadd [#allocation3], 4294965248 }
  0xd1   :  { %3350 = dma.done.wait [#allocation6], 32  }
  0xd2   :  { %3351 = vsyncadd [#allocation6], 4294967264 }
  0xd3   :  { %3352 = dma.done.wait [#allocation9], 32  }
  0xd4   :  { %3353 = vsyncadd [#allocation9], 4294967264 }
  0xd5   :  { %3354 = dma.done.wait [#allocation12], 32  }
  0xd6   :  { %3355 = vsyncadd [#allocation12], 4294967264 }
  0xd7   :  { %3356 = dma.done.wait [#allocation15], 32  }
  0xd8   :  { %3357 = vsyncadd [#allocation15], 4294967264 }
  0xd9   :  { %3358 = dma.done.wait [#allocation18], 32  }
  0xda   :  { %3359 = vsyncadd [#allocation18], 4294967264 }
  0xdb   :  { %3360 = dma.done.wait [#allocation21], 528  }
  0xdc   :  { %3361 = vsyncadd [#allocation21], 4294966768 }
  0xdd   :  { %3362 = dma.done.wait [#allocation24], 32  }
  0xde   :  { %3363 = vsyncadd [#allocation24], 4294967264 }
  0xdf   :  { %3364 = dma.done.wait [#allocation27], 2080  }
  0xe0   :  { %3365 = vsyncadd [#allocation27], 4294965216  ;;  %v2804_v0 = vld [vmem:[#allocation2 + $0x78] sm:$0xff]   ;;  %v2806_v2 = vld [vmem:[#allocation2 + $0x70] sm:$0xff]   ;;  %s4676_s4 = sld [smem:[#allocation43_spill]]  ;;  %vm882_vm0 = vcmask 523264  }
  0xe1   :  { %v2805_v1 = vld [vmem:[#allocation2 + $0x38] sm:$0xff]   ;;  %2542 = vmatprep.subr.bf16.mxu0 %v2804_v0  ;;  %2762 = vmatprep.subr.bf16.mxu1 %v2804_v0  ;;  %v2807_v3 = vld [vmem:[#allocation2 + $0x30] sm:$0xff]   ;;  %v2808_v4 = vld [vmem:[#allocation2 + $0x68] sm:$0xff]   ;;  %s4677_s3 = sld [smem:[#allocation49_spill]] }
  0xe2   :  { %2543 = vmatpush3.bf16.msra.mxu0 %v2805_v1  ;;  %2770 = vmatpush3.bf16.msra.mxu1 %v2805_v1  ;;  %v2809_v5 = vld [vmem:[#allocation2 + $0x28] sm:$0xff]   ;;  %v2810_v6 = vld [vmem:[#allocation2 + $0x60] sm:$0xff]   ;;  %v2812_v8 = vld [vmem:[#allocation2 + $0x58] sm:$0xff]   ;;  %s4678_s17 = sld [smem:[#allocation44_spill]] }
  0xe3   :  { %2544 = vmatprep.subr.bf16.mxu0 %v2806_v2  ;;  %2763 = vmatprep.subr.bf16.mxu1 %v2806_v2  ;;  %v2811_v7 = vld [vmem:[#allocation2 + $0x20] sm:$0xff]   ;;  %v2813_v9 = vld [vmem:[#allocation2 + $0x18] sm:$0xff]   ;;  %v2814_v10 = vld [vmem:[#allocation2 + $0x50] sm:$0xff]  }
  0xe4   :  { %v2815_v15 = vld [vmem:[#allocation2 + $0x10] sm:$0xff]   ;;  %v2816_v17 = vld [vmem:[#allocation2 + $0x48] sm:$0xff]   ;;  %v2818_v20 = vld [vmem:[#allocation2 + $0x40] sm:$0xff]  }
  0xe5   :  { %v2817_v19 = vld [vmem:[#allocation2 + $0x8] sm:$0xff]   ;;  %v2819_v21 = vld [vmem:[#allocation2] sm:$0xff]  }
  0xe6   :  { %2545 = vmatpush3.bf16.msra.mxu0 %v2807_v3  ;;  %2771 = vmatpush3.bf16.msra.mxu1 %v2807_v3  ;;  %v279_v11 = vld [vmem:[%s4676_s4 + $0x8] sm:$0xff]  ;;  %v281_v12 = vld [vmem:[%s4676_s4 + $0x18] sm:$0xff]  ;;  %v278_v22 = vld [vmem:[%s4676_s4] sm:$0xff] }
  0xe7   :  { %2546 = vmatprep.subr.bf16.mxu0 %v2808_v4  ;;  %2764 = vmatprep.subr.bf16.mxu1 %v2808_v4  ;;  %v343_v13 = vpack.c.bf16 %v281_v12, %v279_v11  ;;  %v295_v14 = vld [vmem:[%s4676_s4 + $0x88] sm:$0xff]  ;;  %v297_v16 = vld [vmem:[%s4676_s4 + $0x98] sm:$0xff]  ;;  %v280_v23 = vld [vmem:[%s4676_s4 + $0x10] sm:$0xff] }
  0xe8   :  { %v351_v18 = vpack.c.bf16 %v297_v16, %v295_v14  ;;  %v294_v24 = vld [vmem:[%s4676_s4 + $0x80] sm:$0xff]  ;;  %v296_v25 = vld [vmem:[%s4676_s4 + $0x90] sm:$0xff]  ;;  %v283_v26 = vld [vmem:[%s4676_s4 + $0x28] sm:$0xff]  ;;  %v342_v30 = vpack.c.bf16 %v280_v23, %v278_v22 }
  0xe9   :  { %493 = vmatprep.mubr.bf16.mxu0 %v343_v13  ;;  %v285_v27 = vld [vmem:[%s4676_s4 + $0x38] sm:$0xff]  ;;  %v299_v28 = vld [vmem:[%s4676_s4 + $0xa8] sm:$0xff]  ;;  %v350_v31 = vpack.c.bf16 %v296_v25, %v294_v24  ;;  %v282_v34 = vld [vmem:[%s4676_s4 + $0x20] sm:$0xff] }
  0xea   :  { %2547 = vmatpush3.bf16.msra.mxu0 %v2809_v5  ;;  %2772 = vmatpush3.bf16.msra.mxu1 %v2809_v5  ;;  %v301_v29 = vld [vmem:[%s4676_s4 + $0xb8] sm:$0xff]  ;;  %v345_v32 = vpack.c.bf16 %v285_v27, %v283_v26  ;;  %v284_v35 = vld [vmem:[%s4676_s4 + $0x30] sm:$0xff]  ;;  %v298_v36 = vld [vmem:[%s4676_s4 + $0xa0] sm:$0xff] }
  0xeb   :  { %2548 = vmatprep.subr.bf16.mxu0 %v2810_v6  ;;  %2765 = vmatprep.subr.bf16.mxu1 %v2810_v6  ;;  %v353_v33 = vpack.c.bf16 %v301_v29, %v299_v28  ;;  %v300_v37 = vld [vmem:[%s4676_s4 + $0xb0] sm:$0xff]  ;;  %v287_v38 = vld [vmem:[%s4676_s4 + $0x48] sm:$0xff]  ;;  %v289_v39 = vld [vmem:[%s4676_s4 + $0x58] sm:$0xff]  ;;  %v344_v42 = vpack.c.bf16 %v284_v35, %v282_v34 }
  0xec   :  { %525 = vmatprep.mubr.bf16.mxu1 %v351_v18  ;;  %v303_v40 = vld [vmem:[%s4676_s4 + $0xc8] sm:$0xff]  ;;  %v305_v41 = vld [vmem:[%s4676_s4 + $0xd8] sm:$0xff]  ;;  %v352_v43 = vpack.c.bf16 %v300_v37, %v298_v36  ;;  %v347_v44 = vpack.c.bf16 %v289_v39, %v287_v38  ;;  %v286_v46 = vld [vmem:[%s4676_s4 + $0x40] sm:$0xff] }
  0xed   :  { %v355_v45 = vpack.c.bf16 %v305_v41, %v303_v40  ;;  %v288_v47 = vld [vmem:[%s4676_s4 + $0x50] sm:$0xff]  ;;  %v302_v48 = vld [vmem:[%s4676_s4 + $0xc0] sm:$0xff]  ;;  %v291_v50 = vld [vmem:[%s4676_s4 + $0x68] sm:$0xff] }
  0xee   :  { %2549 = vmatpush3.bf16.msra.mxu0 %v2811_v7  ;;  %2773 = vmatpush3.bf16.msra.mxu1 %v2811_v7  ;;  %v304_v49 = vld [vmem:[%s4676_s4 + $0xd0] sm:$0xff]  ;;  %v293_v51 = vld [vmem:[%s4676_s4 + $0x78] sm:$0xff]  ;;  %v307_v52 = vld [vmem:[%s4676_s4 + $0xe8] sm:$0xff]  ;;  %v346_v54 = vpack.c.bf16 %v288_v47, %v286_v46 }
  0xef   :  { %2550 = vmatprep.subr.bf16.mxu0 %v2812_v8  ;;  %2766 = vmatprep.subr.bf16.mxu1 %v2812_v8  ;;  %v309_v53 = vld [vmem:[%s4676_s4 + $0xf8] sm:$0xff]  ;;  %v354_v55 = vpack.c.bf16 %v304_v49, %v302_v48  ;;  %v349_v56 = vpack.c.bf16 %v293_v51, %v291_v50  ;;  %v290_v58 = vld [vmem:[%s4676_s4 + $0x60] sm:$0xff]  ;;  %v292_v59 = vld [vmem:[%s4676_s4 + $0x70] sm:$0xff] }
  0xf0   :  { %v357_v57 = vpack.c.bf16 %v309_v53, %v307_v52  ;;  %v306_v60 = vld [vmem:[%s4676_s4 + $0xe0] sm:$0xff]  ;;  %v308_v61 = vld [vmem:[%s4676_s4 + $0xf0] sm:$0xff]  ;;  %v348_v62 = vpack.c.bf16 %v292_v59, %v290_v58  ;;  %v2820_v0 = vld [vmem:[%s4677_s3 + $0x38] sm:$0xff]  }
  0xf1   :  { %v356_v63 = vpack.c.bf16 %v308_v61, %v306_v60  ;;  %v2821_v1 = vld [vmem:[%s4677_s3 + $0x30] sm:$0xff]   ;;  %v2822_v2 = vld [vmem:[%s4677_s3 + $0x28] sm:$0xff]   ;;  %v2823_v3 = vld [vmem:[%s4677_s3 + $0x20] sm:$0xff]  }
  0xf2   :  { %2551 = vmatpush3.bf16.msra.mxu0 %v2813_v9  ;;  %2774 = vmatpush3.bf16.msra.mxu1 %v2813_v9  ;;  %v2824_v4 = vld [vmem:[%s4677_s3 + $0x18] sm:$0xff]   ;;  %v2825_v5 = vld [vmem:[%s4677_s3 + $0x10] sm:$0xff]   ;;  %v2826_v6 = vld [vmem:[%s4677_s3 + $0x8] sm:$0xff]  }
  0xf3   :  { %2552 = vmatprep.subr.bf16.mxu0 %v2814_v10  ;;  %2767 = vmatprep.subr.bf16.mxu1 %v2814_v10  ;;  %v2827_v7 = vld [vmem:[%s4677_s3] sm:$0xff]  }
  0xf4   :  { %v3696_v26 = vld [vmem:[#allocation5] ss:$0 sm:$0xff] }
  0xf6   :  { %2553 = vmatpush3.bf16.msra.mxu0 %v2815_v15  ;;  %2775 = vmatpush3.bf16.msra.mxu1 %v2815_v15 }
  0xf7   :  { %2554 = vmatprep.subr.bf16.mxu0 %v2816_v17  ;;  %2768 = vmatprep.subr.bf16.mxu1 %v2816_v17 }
  0xfa   :  { %2555 = vmatpush3.bf16.msra.mxu0 %v2817_v19  ;;  %2776 = vmatpush3.bf16.msra.mxu1 %v2817_v19 }
  0xfb   :  { %2556 = vmatprep.subr.bf16.mxu0 %v2818_v20  ;;  %2769 = vmatprep.subr.bf16.mxu1 %v2818_v20 }
  0xfe   :  { %2557 = vmatpush3.bf16.msra.mxu0 %v2819_v21  ;;  %2777 = vmatpush3.bf16.msra.mxu1 %v2819_v21 }
  0xff   :  { %2658 = vmatprep.subr.bf16.mxu1 %v2820_v0 }
 0x101   :  { %494 = vmatmul.mubr.bf16.vlgmr.msra.gmra.mxu0 %v342_v30  ;;  %526 = vmatmul.mubr.bf16.vlgmr.msra.gmra.mxu1 %v350_v31 }
 0x102   :  { %501 = vmatprep.mubr.bf16.mxu0 %v345_v32  ;;  %533 = vmatprep.mubr.bf16.mxu1 %v353_v33 }
 0x103   :  { %2659 = vmatpush3.bf16.msra.mxu1 %v2820_v0 }
 0x104   :  { %2660 = vmatprep.subr.bf16.mxu1 %v2821_v1 }
 0x107   :  { %2661 = vmatpush3.bf16.msra.mxu1 %v2821_v1 }
 0x108   :  { %2662 = vmatprep.subr.bf16.mxu1 %v2822_v2 }
 0x109   :  { %502 = vmatmul.mubr.bf16.gmra.mxu0 %v344_v42  ;;  %534 = vmatmul.mubr.bf16.gmra.mxu1 %v352_v43 }
 0x10a   :  { %509 = vmatprep.mubr.bf16.mxu0 %v347_v44  ;;  %541 = vmatprep.mubr.bf16.mxu1 %v355_v45 }
 0x10b   :  { %2663 = vmatpush3.bf16.msra.mxu1 %v2822_v2 }
 0x10c   :  { %2664 = vmatprep.subr.bf16.mxu1 %v2823_v3 }
 0x10f   :  { %2665 = vmatpush3.bf16.msra.mxu1 %v2823_v3 }
 0x110   :  { %2666 = vmatprep.subr.bf16.mxu1 %v2824_v4 }
 0x111   :  { %510 = vmatmul.mubr.bf16.gmra.mxu0 %v346_v54  ;;  %542 = vmatmul.mubr.bf16.gmra.mxu1 %v354_v55 }
 0x112   :  { %517 = vmatprep.mubr.bf16.mxu0 %v349_v56  ;;  %549 = vmatprep.mubr.bf16.mxu1 %v357_v57 }
 0x113   :  { %2667 = vmatpush3.bf16.msra.mxu1 %v2824_v4 }
 0x114   :  { %2668 = vmatprep.subr.bf16.mxu1 %v2825_v5 }
 0x117   :  { %2669 = vmatpush3.bf16.msra.mxu1 %v2825_v5 }
 0x118   :  { %2670 = vmatprep.subr.bf16.mxu1 %v2826_v6 }
 0x119   :  { %518 = vmatmul.mubr.bf16.gmra.mxu0 %v348_v62  ;;  %550 = vmatmul.mubr.bf16.gmra.mxu1 %v356_v63 }
 0x11b   :  { %2671 = vmatpush3.bf16.msra.mxu1 %v2826_v6 }
 0x11c   :  { %2672 = vmatprep.subr.bf16.mxu1 %v2827_v7 }
 0x11f   :  { %2673 = vmatpush3.bf16.msra.mxu1 %v2827_v7 }
 0x1c1   :  { %v2558_v8 = vpop.f32.mrf.mxu0  ;;  %v2582_v9 = vpop.f32.mrf.mxu1 }
 0x1c3   :  { %v2559_v10 = vpop.f32.mrf.mxu0  ;;  %v2583_v11 = vpop.f32.mrf.mxu1 }
 0x1c4   :  { %v2560_v23 = vadd.f32 %v2559_v10, %v2558_v8  ;;  %v2584_v58 = vadd.f32 %v2583_v11, %v2582_v9 }
 0x1c5   :  { %v2561_v12 = vpop.f32.mrf.mxu0  ;;  %v2585_v13 = vpop.f32.mrf.mxu1 }
 0x1c6   :  { %v3702_v32 = vadd.f32 %v2560_v23, %v3696_v26  ;;  %v3740_v9 = vadd.f32 %v2584_v58, %v3696_v26 }
 0x1c7   :  { %v2562_v14 = vpop.f32.mrf.mxu0  ;;  %v2586_v15 = vpop.f32.mrf.mxu1 }
 0x1c8   :  { %v2563_v22 = vadd.f32 %v2562_v14, %v2561_v12  ;;  %v581_v41 = vmul.f32 %v3702_v32, %v3702_v32  ;;  %v2587_v1 = vadd.f32 %v2586_v15, %v2585_v13 }
 0x1c9   :  { %v2564_v16 = vpop.f32.mrf.mxu0  ;;  %v2588_v17 = vpop.f32.mrf.mxu1 }
 0x1ca   :  { %v3699_v30 = vadd.f32 %v2563_v22, %v3696_v26  ;;  %v3747_v14 = vadd.f32 %v2587_v1, %v3696_v26 }
 0x1cb   :  { %v2565_v18 = vpop.f32.mrf.mxu0  ;;  %v2589_v19 = vpop.f32.mrf.mxu1 }
 0x1cc   :  { %v2566_v27 = vadd.f32 %v2565_v18, %v2564_v16  ;;  %v582_v39 = vmul.f32 %v3699_v30, %v3699_v30  ;;  %v560_v43 = vadd.f32 %v3699_v30, %v3702_v32  ;;  %v2590_v7 = vadd.f32 %v2589_v19, %v2588_v17 }
 0x1cd   :  { %v2567_v20 = vpop.f32.mrf.mxu0  ;;  %v2591_v21 = vpop.f32.mrf.mxu1 }
 0x1ce   :  { %v3705_v35 = vadd.f32 %v2566_v27, %v3696_v26  ;;  %v597_v49 = vadd.f32 %v582_v39, %v581_v41  ;;  %v3753_v18 = vadd.f32 %v2590_v7, %v3696_v26 }
 0x1cf   :  { %v2568_v24 = vpop.f32.mrf.mxu0  ;;  %v2592_v25 = vpop.f32.mrf.mxu1 }
 0x1d0   :  { %v2569_v31 = vadd.f32 %v2568_v24, %v2567_v20  ;;  %v583_v44 = vmul.f32 %v3705_v35, %v3705_v35  ;;  %v561_v50 = vadd.f32 %v560_v43, %v3705_v35  ;;  %v2593_v13 = vadd.f32 %v2592_v25, %v2591_v21 }
 0x1d1   :  { %v2570_v28 = vpop.f32.mrf.mxu0  ;;  %v2594_v29 = vpop.f32.mrf.mxu1  ;;  %v589_v20 = vmul.f32 %v3740_v9, %v3740_v9  ;;  %v590_v25 = vmul.f32 %v3747_v14, %v3747_v14 }
 0x1d2   :  { %v3710_v40 = vadd.f32 %v2569_v31, %v3696_v26  ;;  %v598_v54 = vadd.f32 %v597_v49, %v583_v44  ;;  %v3759_v24 = vadd.f32 %v2593_v13, %v3696_v26 }
 0x1d3   :  { %v2571_v33 = vpop.f32.mrf.mxu0  ;;  %v2595_v34 = vpop.f32.mrf.mxu1 }
 0x1d4   :  { %v2572_v36 = vadd.f32 %v2571_v33, %v2570_v28  ;;  %v584_v51 = vmul.f32 %v3710_v40, %v3710_v40  ;;  %v562_v55 = vadd.f32 %v561_v50, %v3710_v40  ;;  %v2596_v22 = vadd.f32 %v2595_v34, %v2594_v29 }
 0x1d5   :  { %v2573_v37 = vpop.f32.mrf.mxu0  ;;  %v2597_v38 = vpop.f32.mrf.mxu1  ;;  %v591_v33 = vmul.f32 %v3753_v18, %v3753_v18  ;;  %v592_v41 = vmul.f32 %v3759_v24, %v3759_v24 }
 0x1d6   :  { %v3719_v45 = vadd.f32 %v2572_v36, %v3696_v26  ;;  %v599_v61 = vadd.f32 %v598_v54, %v584_v51 }
 0x1d7   :  { %v2574_v42 = vpop.f32.mrf.mxu0  ;;  %v2598_v48 = vpop.f32.mrf.mxu1 }
 0x1d8   :  { %v2575_v46 = vadd.f32 %v2574_v42, %v2573_v37  ;;  %v585_v56 = vmul.f32 %v3719_v45, %v3719_v45  ;;  %v563_v62 = vadd.f32 %v562_v55, %v3719_v45  ;;  %v2599_v31 = vadd.f32 %v2598_v48, %v2597_v38 }
 0x1d9   :  { %v2576_v47 = vpop.f32.mrf.mxu0  ;;  %v2600_v60 = vpop.f32.mrf.mxu1  ;;  %v3767_v37 = vadd.f32 %v2596_v22, %v3696_v26 }
 0x1da   :  { %v3725_v52 = vadd.f32 %v2575_v46, %v3696_v26  ;;  %v600_v3 = vadd.f32 %v599_v61, %v585_v56  ;;  %v3773_v42 = vadd.f32 %v2599_v31, %v3696_v26 }
 0x1db   :  { %v2577_v53 = vpop.f32.mrf.mxu0  ;;  %v2601_v8 = vpop.f32.mrf.mxu1  ;;  %v593_v46 = vmul.f32 %v3767_v37, %v3767_v37 }
 0x1dc   :  { %v2578_v57 = vadd.f32 %v2577_v53, %v2576_v47  ;;  %v586_v63 = vmul.f32 %v3725_v52, %v3725_v52  ;;  %v564_v4 = vadd.f32 %v563_v62, %v3725_v52  ;;  %v2602_v39 = vadd.f32 %v2601_v8, %v2600_v60 }
 0x1dd   :  { %v2579_v59 = vpop.f32.mrf.mxu0  ;;  %v2603_v19 = vpop.f32.mrf.mxu1  ;;  %v594_v51 = vmul.f32 %v3773_v42, %v3773_v42 }
 0x1de   :  { %v3734_v0 = vadd.f32 %v2578_v57, %v3696_v26  ;;  %v601_v10 = vadd.f32 %v600_v3, %v586_v63  ;;  %v3780_v49 = vadd.f32 %v2602_v39, %v3696_v26 }
 0x1df   :  { %v2580_v2 = vpop.f32.mrf.mxu0  ;;  %v2604_v36 = vpop.f32.mrf.mxu1 }
 0x1e0   :  { %v587_v5 = vmul.f32 %v3734_v0, %v3734_v0  ;;  %v2581_v6 = vadd.f32 %v2580_v2, %v2579_v59  ;;  %v565_v11 = vadd.f32 %v564_v4, %v3734_v0  ;;  %v2605_v44 = vadd.f32 %v2604_v36, %v2603_v19 }
 0x1e1   :  { %v595_v57 = vmul.f32 %v3780_v49, %v3780_v49 }
 0x1e2   :  { %v3744_v12 = vadd.f32 %v2581_v6, %v3696_v26  ;;  %v602_v15 = vadd.f32 %v601_v10, %v587_v5  ;;  %v3786_v54 = vadd.f32 %v2605_v44, %v3696_v26 }
 0x1e4   :  { %v566_v16 = vadd.f32 %v565_v11, %v3744_v12  ;;  %v588_v17 = vmul.f32 %v3744_v12, %v3744_v12  ;;  %v596_v60 = vmul.f32 %v3786_v54, %v3786_v54 }
 0x1e6   :  { %v567_v23 = vadd.f32 %v566_v16, %v3740_v9  ;;  %v603_v21 = vadd.f32 %v602_v15, %v588_v17 }
 0x1e8   :  { %v568_v27 = vadd.f32 %v567_v23, %v3747_v14  ;;  %v604_v28 = vadd.f32 %v603_v21, %v589_v20  ;;  %v629_v20 = vlaneseq  ;;  %v558_v23 = vld [vmem:[#allocation7] sm:$0x1] }
 0x1ea   :  { %v605_v29 = vadd.f32 %v604_v28, %v590_v25  ;;  %v569_v34 = vadd.f32 %v568_v27, %v3753_v18  ;;  %v3794_v22 = vshrl.u32 %v629_v20, 7  ;;  %v559_v28 = vld [vmem:[#allocation8] sm:$0x1] }
 0x1ec   :  { %v570_v43 = vadd.f32 %v569_v34, %v3759_v24  ;;  %v606_v38 = vadd.f32 %v605_v29, %v591_v33  ;;  %v3797_v21 = vsub.s32 0, %v3794_v22 }
 0x1ee   :  { %v571_v47 = vadd.f32 %v570_v43, %v3767_v37  ;;  %v607_v48 = vadd.f32 %v606_v38, %v592_v41 }
 0x1f0   :  { %v572_v50 = vadd.f32 %v571_v47, %v3773_v42  ;;  %v608_v53 = vadd.f32 %v607_v48, %v593_v46 }
 0x1f2   :  { %v609_v55 = vadd.f32 %v608_v53, %v594_v51  ;;  %v573_v56 = vadd.f32 %v572_v50, %v3780_v49 }
 0x1f4   :  { %v610_v58 = vadd.f32 %v609_v55, %v595_v57  ;;  %v574_v59 = vadd.f32 %v573_v56, %v3786_v54 }
 0x1f6   :  { %v575_v61 = vrot.slane %v574_v59, 4  ;;  %v611_v62 = vadd.f32 %v610_v58, %v596_v60 }
 0x1f8   :  { %v576_v63 = vadd.f32 %v575_v61, %v574_v59  ;;  %v612_v1 = vrot.slane %v611_v62, 4 }
 0x1fa   :  { %v577_v2 = vrot.slane %v576_v63, 2  ;;  %v613_v3 = vadd.f32 %v612_v1, %v611_v62 }
 0x1fc   :  { %v578_v26 = vadd.f32 %v577_v2, %v576_v63  ;;  %v614_v4 = vrot.slane %v613_v3, 2 }
 0x1fe   :  { %v579_v5 = vrot.slane %v578_v26, 1  ;;  %v615_v6 = vadd.f32 %v614_v4, %v613_v3 }
 0x200   :  { %v580_v7 = vadd.f32 %v579_v5, %v578_v26  ;;  %v616_v8 = vrot.slane %v615_v6, 1 }
 0x202   :  { %v617_v10 = vadd.f32 %v616_v8, %v615_v6  ;;  %v618_v11 = vmul.f32 0.0078125, %v580_v7 }
 0x204   :  { %v619_v13 = vmul.f32 0.0078125, %v617_v10  ;;  %v620_v15 = vmul.f32 %v618_v11, %v618_v11 }
 0x206   :  { %v621_v16 = vsub.f32 %v619_v13, %v620_v15 }
 0x208   :  { %v622_v17 = vmax.f32 %v621_v16, 0.0 }
 0x20a   :  { %v623_v19 = vadd.f32 1e-05, %v622_v17 }
 0x20c   :  { %2864 = vrsqrt.f32 %v623_v19 }
 0x219   :  { %v2865_v25 = vpop.eup %2864 }
 0x21a   :  { %v625_v27 = vmul.f32 %v2865_v25, %v558_v23 }
 0x21c   :  { %v626_v31 = vmul.f32 %v625_v27, %v618_v11  ;;  %v3800_v33 = vrot.slane %v625_v27, %v3797_v21 }
 0x21e   :  { %v627_v36 = vsub.f32 %v559_v28, %v626_v31  ;;  %v634_v29 = vmul.f32 %v3800_v33, %v3702_v32  ;;  %v635_v34 = vmul.f32 %v3800_v33, %v3699_v30  ;;  %v636_v39 = vmul.f32 %v3800_v33, %v3705_v35 }
 0x21f   :  { %v637_v43 = vmul.f32 %v3800_v33, %v3710_v40  ;;  %v638_v38 = vmul.f32 %v3800_v33, %v3719_v45  ;;  %v639_v44 = vmul.f32 %v3800_v33, %v3725_v52  ;;  %v640_v32 = vmul.f32 %v3800_v33, %v3734_v0 }
 0x220   :  { %v3809_v41 = vrot.slane %v627_v36, %v3797_v21  ;;  %v641_v30 = vmul.f32 %v3800_v33, %v3744_v12  ;;  %v642_v35 = vmul.f32 %v3800_v33, %v3740_v9  ;;  %v643_v46 = vmul.f32 %v3800_v33, %v3747_v14 }
 0x221   :  { %v644_v13 = vmul.f32 %v3800_v33, %v3753_v18  ;;  %v645_v15 = vmul.f32 %v3800_v33, %v3759_v24  ;;  %v646_v16 = vmul.f32 %v3800_v33, %v3767_v37  ;;  %v647_v17 = vmul.f32 %v3800_v33, %v3773_v42 }
 0x222   :  { %v656_v40 = vadd.f32 %v3809_v41, %v634_v29  ;;  %v657_v47 = vadd.f32 %v3809_v41, %v635_v34  ;;  %v658_v45 = vadd.f32 %v3809_v41, %v636_v39  ;;  %v659_v52 = vadd.f32 %v3809_v41, %v637_v43 }
 0x223   :  { %v660_v48 = vadd.f32 %v3809_v41, %v638_v38  ;;  %v661_v0 = vadd.f32 %v3809_v41, %v639_v44  ;;  %v662_v12 = vadd.f32 %v3809_v41, %v640_v32  ;;  %v663_v50 = vadd.f32 %v3809_v41, %v641_v30 }
 0x224   :  { %v672_v9 = vmul.f32 0.2, %v656_v40  ;;  %v673_v51 = vmul.f32 0.2, %v657_v47  ;;  %v674_v53 = vmul.f32 0.2, %v658_v45  ;;  %v664_v14 = vadd.f32 %v3809_v41, %v642_v35 }
 0x225   :  { %v675_v55 = vmul.f32 0.2, %v659_v52  ;;  %v676_v56 = vmul.f32 0.2, %v660_v48  ;;  %v677_v57 = vmul.f32 0.2, %v661_v0  ;;  %v665_v58 = vadd.f32 %v3809_v41, %v643_v46 }
 0x226   :  { %v688_v59 = vmax.f32 %v656_v40, %v672_v9  ;;  %v689_v60 = vmax.f32 %v657_v47, %v673_v51  ;;  %v690_v61 = vmax.f32 %v658_v45, %v674_v53  ;;  %v678_v62 = vmul.f32 0.2, %v662_v12  ;;  %v1279_v9 = vld [vmem:[%s4678_s17 + $0x20] sm:$0xff]  ;;  %v1280_v51 = vld [vmem:[%s4678_s17 + $0x28] sm:$0xff]  ;;  %v1281_v53 = vld [vmem:[%s4678_s17 + $0x30] sm:$0xff] }
 0x227   :  { %v691_v63 = vmax.f32 %v659_v52, %v675_v55  ;;  %v692_v1 = vmax.f32 %v660_v48, %v676_v56  ;;  %v693_v2 = vmax.f32 %v661_v0, %v677_v57  ;;  %v679_v3 = vmul.f32 0.2, %v663_v50  ;;  %v2831_v52 = vld [vmem:[%s4646_s10] sm:$0xff]   ;;  %v1277_v0 = vld [vmem:[%s4678_s17 + $0x10] sm:$0xff] }
 0x228   :  { %v720_v26 = vpack.c.bf16 %v689_v60, %v688_v59  ;;  %v694_v4 = vmax.f32 %v662_v12, %v678_v62  ;;  %v680_v8 = vmul.f32 0.2, %v664_v14  ;;  %v681_v10 = vmul.f32 0.2, %v665_v58  ;;  %v1275_v48 = vld [vmem:[%s4678_s17] sm:$0xff]  ;;  %1311 = vrot.lane.b32.xlu1 %v1277_v0, %s3377_s26  ;;  %v1276_v12 = vld [vmem:[%s4678_s17 + $0x8] sm:$0xff] }
 0x229   :  { %v721_v5 = vpack.c.bf16 %v691_v63, %v690_v61  ;;  %v695_v6 = vmax.f32 %v663_v50, %v679_v3  ;;  %v722_v7 = vpack.c.bf16 %v693_v2, %v692_v1  ;;  %v666_v19 = vadd.f32 %v3809_v41, %v644_v13  ;;  %1307 = vrot.lane.b32.xlu0 %v1275_v48, %s3377_s26  ;;  %v1278_v50 = vld [vmem:[%s4678_s17 + $0x18] sm:$0xff]  ;;  %v3895_v56 = vld [vmem:[#allocation10] ss:$0 sm:$0xff]  ;;  %v1284_v60 = vld [vmem:[%s4678_s17 + $0x48] sm:$0xff] }
 0x22a   :  { %2674 = vmatprep.mubr.bf16.mxu1 %v720_v26  ;;  %v667_v20 = vadd.f32 %v3809_v41, %v645_v15  ;;  %v696_v23 = vmax.f32 %v664_v14, %v680_v8  ;;  %v697_v25 = vmax.f32 %v665_v58, %v681_v10  ;;  %v668_v27 = vadd.f32 %v3809_v41, %v646_v16  ;;  %v1282_v14 = vld [vmem:[%s4678_s17 + $0x38] sm:$0xff]  ;;  %v1283_v59 = vld [vmem:[%s4678_s17 + $0x40] sm:$0xff]  ;;  %v1285_v26 = vld [vmem:[%s4678_s17 + $0x50] sm:$0xff] }
 0x22b   :  { %2675 = vmatmul.mubr.bf16.vlgmr.msra.gmra.mxu1 %v721_v5  ;;  %v723_v11 = vpack.c.bf16 %v695_v6, %v694_v4  ;;  %v669_v18 = vadd.f32 %v3809_v41, %v647_v17  ;;  %v682_v28 = vmul.f32 0.2, %v666_v19  ;;  %v649_v37 = vmul.f32 %v3800_v33, %v3786_v54  ;;  %v1286_v4 = vld [vmem:[%s4678_s17 + $0x58] sm:$0xff] }
 0x22c   :  { %2678 = vmatprep.mubr.bf16.mxu1 %v722_v7  ;;  %v683_v31 = vmul.f32 0.2, %v667_v20  ;;  %v724_v24 = vpack.c.bf16 %v697_v25, %v696_v23  ;;  %v684_v36 = vmul.f32 0.2, %v668_v27  ;;  %v648_v42 = vmul.f32 %v3800_v33, %v3780_v49  ;;  %v2828_v49 = vld [vmem:[%s4646_s10 + $0x18] sm:$0xff]   ;;  %v2829_v33 = vld [vmem:[%s4646_s10 + $0x10] sm:$0xff]   ;;  %1313 = vrot.lane.b32.xlu1 %v1278_v50, %s3377_s26 }
 0x22d   :  { %v685_v29 = vmul.f32 0.2, %v669_v18  ;;  %v698_v34 = vmax.f32 %v666_v19, %v682_v28  ;;  %v671_v38 = vadd.f32 %v3809_v41, %v649_v37  ;;  %2690 = vmatprep.subr.bf16.mxu1 %v2828_v49  ;;  %1309 = vrot.lane.b32.xlu0 %v1276_v12, %s3377_s26  ;;  %v1287_v23 = vld [vmem:[%s4678_s17 + $0x60] sm:$0xff]  ;;  %v1288_v25 = vld [vmem:[%s4678_s17 + $0x68] sm:$0xff] }
 0x22e   :  { %v699_v39 = vmax.f32 %v667_v20, %v683_v31  ;;  %v670_v43 = vadd.f32 %v3809_v41, %v648_v42  ;;  %v700_v44 = vmax.f32 %v668_v27, %v684_v36  ;;  %2691 = vmatpush3.bf16.msra.mxu1 %v2828_v49  ;;  %v2830_v41 = vld [vmem:[%s4646_s10 + $0x8] sm:$0xff]  }
 0x22f   :  { %v701_v32 = vmax.f32 %v669_v18, %v685_v29  ;;  %v687_v46 = vmul.f32 0.2, %v671_v38  ;;  %2692 = vmatprep.subr.bf16.mxu1 %v2829_v33 }
 0x230   :  { %v725_v30 = vpack.c.bf16 %v699_v39, %v698_v34  ;;  %v686_v35 = vmul.f32 0.2, %v670_v43  ;;  %1317 = vrot.lane.b32.xlu1 %v1280_v51, %s3377_s26 }
 0x231   :  { %v726_v40 = vpack.c.bf16 %v701_v32, %v700_v44  ;;  %v703_v47 = vmax.f32 %v671_v38, %v687_v46  ;;  %1315 = vrot.lane.b32.xlu0 %v1279_v9, %s3377_s26  ;;  %v1289_v32 = vld [vmem:[%s4678_s17 + $0x70] sm:$0xff] }
 0x232   :  { %v702_v54 = vmax.f32 %v670_v43, %v686_v35  ;;  %2693 = vmatpush3.bf16.msra.mxu1 %v2829_v33 }
 0x233   :  { %2679 = vmatmul.mubr.bf16.gmra.mxu1 %v723_v11  ;;  %2694 = vmatprep.subr.bf16.mxu1 %v2830_v41 }
 0x234   :  { %2682 = vmatprep.mubr.bf16.mxu1 %v724_v24  ;;  %v727_v45 = vpack.c.bf16 %v703_v47, %v702_v54  ;;  %1321 = vrot.lane.b32.xlu1 %v1282_v14, %s3377_s26 }
 0x235   :  { %1319 = vrot.lane.b32.xlu0 %v1281_v53, %s3377_s26 }
 0x236   :  { %2695 = vmatpush3.bf16.msra.mxu1 %v2830_v41 }
 0x237   :  { %2696 = vmatprep.subr.bf16.mxu1 %v2831_v52 }
 0x238   :  { %1325 = vrot.lane.b32.xlu1 %v1284_v60, %s3377_s26 }
 0x239   :  { %1323 = vrot.lane.b32.xlu0 %v1283_v59, %s3377_s26 }
 0x23a   :  { %2697 = vmatpush3.bf16.msra.mxu1 %v2831_v52 }
 0x23b   :  { %2683 = vmatmul.mubr.bf16.gmra.mxu1 %v725_v30  ;;  %v1290_v30 = vld [vmem:[%s4678_s17 + $0x78] sm:$0xff] }
 0x23c   :  { %2686 = vmatprep.mubr.bf16.mxu1 %v726_v40  ;;  %1329 = vrot.lane.b32.xlu1 %v1286_v4, %s3377_s26 }
 0x23d   :  { %1327 = vrot.lane.b32.xlu0 %v1285_v26, %s3377_s26 }
 0x240   :  { %1333 = vrot.lane.b32.xlu1 %v1288_v25, %s3377_s26 }
 0x241   :  { %1331 = vrot.lane.b32.xlu0 %v1287_v23, %s3377_s26 }
 0x243   :  { %2687 = vmatmul.mubr.bf16.gmra.mxu1 %v727_v45 }
 0x244   :  { %1337 = vrot.lane.b32.xlu1 %v1290_v30, %s3377_s26 }
 0x245   :  { %1335 = vrot.lane.b32.xlu0 %v1289_v32, %s3377_s26 }
 0x2eb   :  { %v2676_v55 = vpop.f32.mrf.mxu1 }
 0x2ec   :  { %v3909_v62 = vadd.f32 %v2676_v55, %v3895_v56 }
 0x2ed   :  { %v817_v57 = vpop.f32.mrf.mxu1 }
 0x2ee   :  { %v3900_v58 = vadd.f32 %v3895_v56, %v817_v57  ;;  %v922_v6 = vmul.f32 %v3909_v62, %v3909_v62  ;;  %v886_v11 = vsel %vm882_vm0, %v3909_v62, 0.0 }
 0x2ef   :  { %v2677_v61 = vpop.f32.mrf.mxu1 }
 0x2f0   :  { %v920_v1 = vmul.f32 %v3900_v58, %v3900_v58  ;;  %v3916_v2 = vadd.f32 %v2677_v61, %v3895_v56  ;;  %v883_v7 = vsel %vm882_vm0, %v3900_v58, 0.0  ;;  %v939_v31 = vsel %vm882_vm0, %v922_v6, 0.0 }
 0x2f1   :  { %v820_v63 = vpop.f32.mrf.mxu1 }
 0x2f2   :  { %v3919_v3 = vadd.f32 %v3895_v56, %v820_v63  ;;  %v936_v16 = vsel %vm882_vm0, %v920_v1, 0.0  ;;  %v923_v17 = vmul.f32 %v3916_v2, %v3916_v2  ;;  %v888_v24 = vsel %vm882_vm0, %v3916_v2, 0.0 }
 0x2f3   :  { %v2680_v5 = vpop.f32.mrf.mxu1 }
 0x2f4   :  { %v884_v8 = vsel %vm882_vm0, %v3919_v3, 0.0  ;;  %v921_v10 = vmul.f32 %v3919_v3, %v3919_v3  ;;  %v3956_v36 = vadd.f32 %v2680_v5, %v3895_v56  ;;  %v941_v39 = vsel %vm882_vm0, %v923_v17, 0.0 }
 0x2f5   :  { %v885_v13 = vadd.f32 %v884_v8, %v883_v7  ;;  %v833_v15 = vpop.f32.mrf.mxu1 }
 0x2f6   :  { %v937_v19 = vsel %vm882_vm0, %v921_v10, 0.0  ;;  %v3944_v20 = vadd.f32 %v3895_v56, %v833_v15  ;;  %v926_v54 = vmul.f32 %v3956_v36, %v3956_v36  ;;  %v894_v48 = vsel %vm882_vm0, %v3956_v36, 0.0 }
 0x2f7   :  { %v887_v27 = vadd.f32 %v886_v11, %v885_v13  ;;  %v938_v18 = vadd.f32 %v937_v19, %v936_v16  ;;  %v2681_v28 = vpop.f32.mrf.mxu1 }
 0x2f8   :  { %v924_v29 = vmul.f32 %v3944_v20, %v3944_v20  ;;  %v890_v43 = vsel %vm882_vm0, %v3944_v20, 0.0  ;;  %v3966_v38 = vadd.f32 %v2681_v28, %v3895_v56  ;;  %v947_v14 = vsel %vm882_vm0, %v926_v54, 0.0 }
 0x2f9   :  { %v940_v37 = vadd.f32 %v939_v31, %v938_v18  ;;  %v889_v42 = vadd.f32 %v888_v24, %v887_v27  ;;  %v836_v34 = vpop.f32.mrf.mxu1 }
 0x2fa   :  { %v3969_v44 = vadd.f32 %v3895_v56, %v836_v34  ;;  %v943_v47 = vsel %vm882_vm0, %v924_v29, 0.0  ;;  %v927_v0 = vmul.f32 %v3966_v38, %v3966_v38  ;;  %v896_v55 = vsel %vm882_vm0, %v3966_v38, 0.0 }
 0x2fb   :  { %v891_v35 = vadd.f32 %v890_v43, %v889_v42  ;;  %v942_v46 = vadd.f32 %v941_v39, %v940_v37  ;;  %v2684_v40 = vpop.f32.mrf.mxu1 }
 0x2fc   :  { %v892_v45 = vsel %vm882_vm0, %v3969_v44, 0.0  ;;  %v925_v49 = vmul.f32 %v3969_v44, %v3969_v44  ;;  %v3998_v57 = vadd.f32 %v2684_v40, %v3895_v56  ;;  %v949_v1 = vsel %vm882_vm0, %v927_v0, 0.0 }
 0x2fd   :  { %v944_v33 = vadd.f32 %v943_v47, %v942_v46  ;;  %v893_v41 = vadd.f32 %v892_v45, %v891_v35  ;;  %v849_v52 = vpop.f32.mrf.mxu1 }
 0x2fe   :  { %v945_v12 = vsel %vm882_vm0, %v925_v49, 0.0  ;;  %v3992_v50 = vadd.f32 %v3895_v56, %v849_v52  ;;  %v930_v10 = vmul.f32 %v3998_v57, %v3998_v57  ;;  %v902_v23 = vsel %vm882_vm0, %v3998_v57, 0.0 }
 0x2ff   :  { %v895_v9 = vadd.f32 %v894_v48, %v893_v41  ;;  %v946_v51 = vadd.f32 %v945_v12, %v944_v33  ;;  %v2685_v53 = vpop.f32.mrf.mxu1 }
 0x300   :  { %v928_v59 = vmul.f32 %v3992_v50, %v3992_v50  ;;  %v898_v26 = vsel %vm882_vm0, %v3992_v50, 0.0  ;;  %v4006_v4 = vadd.f32 %v2685_v53, %v3895_v56  ;;  %v955_v29 = vsel %vm882_vm0, %v930_v10, 0.0 }
 0x301   :  { %v948_v60 = vadd.f32 %v947_v14, %v946_v51  ;;  %v897_v61 = vadd.f32 %v896_v55, %v895_v9  ;;  %v852_v63 = vpop.f32.mrf.mxu1 }
 0x302   :  { %v4009_v5 = vadd.f32 %v3895_v56, %v852_v63  ;;  %v951_v11 = vsel %vm882_vm0, %v928_v59, 0.0  ;;  %v931_v25 = vmul.f32 %v4006_v4, %v4006_v4  ;;  %v904_v37 = vsel %vm882_vm0, %v4006_v4, 0.0 }
 0x303   :  { %v899_v6 = vadd.f32 %v898_v26, %v897_v61  ;;  %v950_v7 = vadd.f32 %v949_v1, %v948_v60  ;;  %v2688_v8 = vpop.f32.mrf.mxu1 }
 0x304   :  { %v900_v13 = vsel %vm882_vm0, %v4009_v5, 0.0  ;;  %v929_v15 = vmul.f32 %v4009_v5, %v4009_v5  ;;  %v4030_v42 = vadd.f32 %v2688_v8, %v3895_v56  ;;  %v957_v30 = vsel %vm882_vm0, %v931_v25, 0.0 }
 0x305   :  { %v952_v16 = vadd.f32 %v951_v11, %v950_v7  ;;  %v901_v17 = vadd.f32 %v900_v13, %v899_v6  ;;  %v865_v19 = vpop.f32.mrf.mxu1 }
 0x306   :  { %v953_v27 = vsel %vm882_vm0, %v929_v15, 0.0  ;;  %v4024_v18 = vadd.f32 %v3895_v56, %v865_v19  ;;  %v934_v45 = vmul.f32 %v4030_v42, %v4030_v42  ;;  %v910_v0 = vsel %vm882_vm0, %v4030_v42, 0.0 }
 0x307   :  { %v903_v28 = vadd.f32 %v902_v23, %v901_v17  ;;  %v954_v31 = vadd.f32 %v953_v27, %v952_v16  ;;  %v2689_v24 = vpop.f32.mrf.mxu1 }
 0x308   :  { %v932_v34 = vmul.f32 %v4024_v18, %v4024_v18  ;;  %v906_v35 = vsel %vm882_vm0, %v4024_v18, 0.0  ;;  %v4038_v46 = vadd.f32 %v2689_v24, %v3895_v56  ;;  %v963_v53 = vsel %vm882_vm0, %v934_v45, 0.0  ;;  %v880_v24 = vld [vmem:[#allocation11] sm:$0x1] }
 0x309   :  { %v956_v39 = vadd.f32 %v955_v29, %v954_v31  ;;  %v905_v43 = vadd.f32 %v904_v37, %v903_v28  ;;  %v868_v32 = vpop.f32.mrf.mxu1 }
 0x30a   :  { %v869_v40 = vadd.f32 %v3895_v56, %v868_v32  ;;  %v959_v49 = vsel %vm882_vm0, %v932_v34, 0.0  ;;  %v935_v12 = vmul.f32 %v4038_v46, %v4038_v46  ;;  %v912_v14 = vsel %vm882_vm0, %v4038_v46, 0.0  ;;  %v881_v34 = vld [vmem:[#allocation13] sm:$0x1] }
 0x30b   :  { %v907_v54 = vadd.f32 %v906_v35, %v905_v43  ;;  %v958_v47 = vadd.f32 %v957_v30, %v956_v39 }
 0x30c   :  { %v908_v33 = vsel %vm882_vm0, %v869_v40, 0.0  ;;  %v933_v41 = vmul.f32 %v869_v40, %v869_v40  ;;  %v965_v60 = vsel %vm882_vm0, %v935_v12, 0.0 }
 0x30d   :  { %v960_v52 = vadd.f32 %v959_v49, %v958_v47  ;;  %v909_v48 = vadd.f32 %v908_v33, %v907_v54 }
 0x30e   :  { %v961_v56 = vsel %vm882_vm0, %v933_v41, 0.0 }
 0x30f   :  { %v911_v9 = vadd.f32 %v910_v0, %v909_v48  ;;  %v962_v51 = vadd.f32 %v961_v56, %v960_v52 }
 0x311   :  { %v913_v55 = vadd.f32 %v912_v14, %v911_v9  ;;  %v964_v59 = vadd.f32 %v963_v53, %v962_v51 }
 0x313   :  { %v914_v61 = vrot.slane %v913_v55, 4  ;;  %v966_v63 = vadd.f32 %v965_v60, %v964_v59 }
 0x315   :  { %v915_v1 = vadd.f32 %v914_v61, %v913_v55  ;;  %v967_v26 = vrot.slane %v966_v63, 4 }
 0x317   :  { %v916_v6 = vrot.slane %v915_v1, 2  ;;  %v968_v7 = vadd.f32 %v967_v26, %v966_v63 }
 0x319   :  { %v917_v8 = vadd.f32 %v916_v6, %v915_v1  ;;  %v969_v10 = vrot.slane %v968_v7, 2 }
 0x31b   :  { %v918_v11 = vrot.slane %v917_v8, 1  ;;  %v970_v13 = vadd.f32 %v969_v10, %v968_v7 }
 0x31d   :  { %v919_v15 = vadd.f32 %v918_v11, %v917_v8  ;;  %v971_v16 = vrot.slane %v970_v13, 1 }
 0x31f   :  { %v972_v17 = vadd.f32 %v971_v16, %v970_v13  ;;  %v973_v19 = vmul.f32 0.0078125, %v919_v15 }
 0x321   :  { %v974_v23 = vmul.f32 0.0078125, %v972_v17  ;;  %v975_v25 = vmul.f32 %v973_v19, %v973_v19 }
 0x323   :  { %v976_v27 = vsub.f32 %v974_v23, %v975_v25 }
 0x325   :  { %v977_v28 = vmax.f32 %v976_v27, 0.0 }
 0x327   :  { %v978_v31 = vadd.f32 1e-05, %v977_v28 }
 0x329   :  { %2866 = vrsqrt.f32 %v978_v31 }
 0x336   :  { %v2867_v29 = vpop.eup %2866 }
 0x337   :  { %v980_v37 = vmul.f32 %v2867_v29, %v880_v24 }
 0x339   :  { %v981_v39 = vmul.f32 %v980_v37, %v973_v19  ;;  %v4055_v43 = vrot.slane %v980_v37, %v3797_v21 }
 0x33b   :  { %v982_v32 = vsub.f32 %v881_v34, %v981_v39  ;;  %v1002_v30 = vmul.f32 %v4055_v43, %v869_v40  ;;  %v989_v35 = vmul.f32 %v4055_v43, %v3900_v58  ;;  %v990_v54 = vmul.f32 %v4055_v43, %v3919_v3 }
 0x33c   :  { %v991_v47 = vmul.f32 %v4055_v43, %v3909_v62  ;;  %v992_v45 = vmul.f32 %v4055_v43, %v3916_v2  ;;  %v993_v33 = vmul.f32 %v4055_v43, %v3944_v20  ;;  %v994_v40 = vmul.f32 %v4055_v43, %v3969_v44 }
 0x33d   :  { %v4067_v49 = vrot.slane %v982_v32, %v3797_v21  ;;  %v995_v58 = vmul.f32 %v4055_v43, %v3956_v36  ;;  %v996_v3 = vmul.f32 %v4055_v43, %v3966_v38  ;;  %v997_v62 = vmul.f32 %v4055_v43, %v3992_v50 }
 0x33e   :  { %v998_v2 = vmul.f32 %v4055_v43, %v4009_v5  ;;  %v999_v41 = vmul.f32 %v4055_v43, %v3998_v57  ;;  %v1000_v36 = vmul.f32 %v4055_v43, %v4006_v4  ;;  %v1001_v60 = vmul.f32 %v4055_v43, %v4024_v18 }
 0x33f   :  { %v1011_v20 = vadd.f32 %v4067_v49, %v989_v35  ;;  %v1012_v52 = vadd.f32 %v4067_v49, %v990_v54  ;;  %v1013_v44 = vadd.f32 %v4067_v49, %v991_v47  ;;  %v1024_v38 = vadd.f32 %v4067_v49, %v1002_v30 }
 0x340   :  { %v1014_v48 = vadd.f32 %v4067_v49, %v992_v45  ;;  %v1015_v50 = vadd.f32 %v4067_v49, %v993_v33  ;;  %v1016_v5 = vadd.f32 %v4067_v49, %v994_v40  ;;  %v1017_v57 = vadd.f32 %v4067_v49, %v995_v58 }
 0x341   :  { %v1027_v0 = vmul.f32 0.2, %v1011_v20  ;;  %v1028_v12 = vmul.f32 0.2, %v1012_v52  ;;  %v1018_v56 = vadd.f32 %v4067_v49, %v996_v3  ;;  %v1029_v9 = vmul.f32 0.2, %v1013_v44 }
 0x342   :  { %v1030_v51 = vmul.f32 0.2, %v1014_v48  ;;  %v1031_v53 = vmul.f32 0.2, %v1015_v50  ;;  %v1019_v14 = vadd.f32 %v4067_v49, %v997_v62  ;;  %v1032_v59 = vmul.f32 0.2, %v1016_v5 }
 0x343   :  { %v1043_v4 = vmax.f32 %v1011_v20, %v1027_v0  ;;  %v1044_v55 = vmax.f32 %v1012_v52, %v1028_v12  ;;  %v1040_v61 = vmul.f32 0.2, %v1024_v38  ;;  %v1045_v63 = vmax.f32 %v1013_v44, %v1029_v9  ;;  %v1308_v9 = vpop.permute.xlu0 %1307 }
 0x344   :  { %v1046_v1 = vmax.f32 %v1014_v48, %v1030_v51  ;;  %v1047_v26 = vmax.f32 %v1015_v50, %v1031_v53  ;;  %v1048_v7 = vmax.f32 %v1016_v5, %v1032_v59  ;;  %v1033_v8 = vmul.f32 0.2, %v1017_v57 }
 0x345   :  { %v1067_v6 = vpack.c.bf16 %v1044_v55, %v1043_v4  ;;  %v1020_v10 = vadd.f32 %v4067_v49, %v998_v2  ;;  %v1034_v13 = vmul.f32 0.2, %v1018_v56  ;;  %v1035_v15 = vmul.f32 0.2, %v1019_v14 }
 0x346   :  { %v1068_v11 = vpack.c.bf16 %v1046_v1, %v1045_v63  ;;  %v1021_v16 = vadd.f32 %v4067_v49, %v999_v41  ;;  %v1069_v17 = vpack.c.bf16 %v1048_v7, %v1047_v26  ;;  %v1022_v18 = vadd.f32 %v4067_v49, %v1000_v36  ;;  %v1312_v63 = vpop.permute.xlu1 %1311 }
 0x347   :  { %2698 = vmatprep.mubr.msk.bf16.mxu1 %vm882_vm0, %v1067_v6  ;;  %v1036_v19 = vmul.f32 0.2, %v1020_v10  ;;  %v1051_v23 = vmax.f32 %v1019_v14, %v1035_v15  ;;  %v1023_v27 = vadd.f32 %v4067_v49, %v1001_v60  ;;  %v1056_v28 = vmax.f32 %v1024_v38, %v1040_v61 }
 0x348   :  { %2699 = vmatmul.mubr.msk.bf16.vlgmr.msra.gmra.mxu1 %vm882_vm0, %v1068_v11  ;;  %v1037_v25 = vmul.f32 0.2, %v1021_v16  ;;  %v1038_v24 = vmul.f32 0.2, %v1022_v18  ;;  %v1049_v29 = vmax.f32 %v1017_v57, %v1033_v8  ;;  %v1050_v37 = vmax.f32 %v1018_v56, %v1034_v13  ;;  %v1310_v8 = vpop.permute.xlu0 %1309 }
 0x349   :  { %2702 = vmatprep.mubr.msk.bf16.mxu1 %vm882_vm0, %v1069_v17  ;;  %v1052_v31 = vmax.f32 %v1020_v10, %v1036_v19  ;;  %v1039_v39 = vmul.f32 0.2, %v1023_v27  ;;  %v1003_v33 = vmul.f32 %v4055_v43, %v4030_v42  ;;  %v1004_v40 = vmul.f32 %v4055_v43, %v4038_v46  ;;  %v2832_v42 = vld [vmem:[%s4648_s12 + $0x18] sm:$0xff]   ;;  %v2833_v46 = vld [vmem:[%s4648_s12 + $0x10] sm:$0xff]   ;;  %v2834_v43 = vld [vmem:[%s4648_s12 + $0x8] sm:$0xff]  }
 0x34a   :  { %v1053_v34 = vmax.f32 %v1021_v16, %v1037_v25  ;;  %v1054_v30 = vmax.f32 %v1022_v18, %v1038_v24  ;;  %v1070_v47 = vpack.c.bf16 %v1050_v37, %v1049_v29  ;;  %2714 = vmatprep.subr.bf16.mxu0 %v2832_v42  ;;  %v2835_v10 = vld [vmem:[%s4648_s12] sm:$0xff]   ;;  %v1314_v25 = vpop.permute.xlu1 %1313  ;;  %s3392_s12 = smov [#allocation30]  }
 0x34b   :  { %v1071_v32 = vpack.c.bf16 %v1052_v31, %v1051_v23  ;;  %v1055_v35 = vmax.f32 %v1023_v27, %v1039_v39  ;;  %v1025_v58 = vadd.f32 %v4067_v49, %v1003_v33  ;;  %v1026_v3 = vadd.f32 %v4067_v49, %v1004_v40  ;;  %2715 = vmatpush3.bf16.msra.mxu0 %v2832_v42  ;;  %v4124_v49 = vld [vmem:[#allocation14] ss:$0 sm:$0xff] }
 0x34c   :  { %v1072_v54 = vpack.c.bf16 %v1054_v30, %v1053_v34  ;;  %2716 = vmatprep.subr.bf16.mxu0 %v2833_v46  ;;  %v1316_v24 = vpop.permute.xlu0 %1315 }
 0x34d   :  { %v1073_v45 = vpack.c.bf16 %v1056_v28, %v1055_v35  ;;  %v1041_v62 = vmul.f32 0.2, %v1025_v58  ;;  %v1042_v2 = vmul.f32 0.2, %v1026_v3 }
 0x34e   :  { %v1318_v33 = vpop.permute.xlu1 %1317 }
 0x34f   :  { %v1057_v41 = vmax.f32 %v1025_v58, %v1041_v62  ;;  %v1058_v20 = vmax.f32 %v1026_v3, %v1042_v2  ;;  %2717 = vmatpush3.bf16.msra.mxu0 %v2833_v46 }
 0x350   :  { %2703 = vmatmul.mubr.msk.bf16.gmra.mxu1 %vm882_vm0, %v1070_v47  ;;  %2718 = vmatprep.subr.bf16.mxu0 %v2834_v43 }
 0x351   :  { %2706 = vmatprep.mubr.msk.bf16.mxu1 %vm882_vm0, %v1071_v32  ;;  %v1074_v52 = vpack.c.bf16 %v1058_v20, %v1057_v41  ;;  %v1320_v20 = vpop.permute.xlu0 %1319 }
 0x353   :  { %2719 = vmatpush3.bf16.msra.mxu0 %v2834_v43 }
 0x354   :  { %2720 = vmatprep.subr.bf16.mxu0 %v2835_v10 }
 0x357   :  { %2721 = vmatpush3.bf16.msra.mxu0 %v2835_v10 }
 0x358   :  { %2707 = vmatmul.mubr.msk.bf16.gmra.mxu1 %vm882_vm0, %v1072_v54 }
 0x359   :  { %2710 = vmatprep.mubr.msk.bf16.mxu1 %vm882_vm0, %v1073_v45 }
 0x360   :  { %2711 = vmatmul.mubr.msk.bf16.gmra.mxu1 %vm882_vm0, %v1074_v52 }
 0x408   :  { %v2700_v44 = vpop.f32.mrf.mxu1 }
 0x409   :  { %v4127_v36 = vadd.f32 %v2700_v44, %v4124_v49 }
 0x40a   :  { %v1164_v38 = vpop.f32.mrf.mxu1 }
 0x40b   :  { %v1229_v48 = vmul.f32 0.5, %v4127_v36  ;;  %2406 = vst [vmem:[#allocation30 + $0x10] sm:$0xff] %v4127_v36  ;;  %v4132_v50 = vadd.f32 %v4124_v49, %v1164_v38 }
 0x40c   :  { %v2701_v5 = vpop.f32.mrf.mxu1 }
 0x40d   :  { %v1227_v0 = vmul.f32 0.5, %v4132_v50  ;;  %2404 = vst [vmem:[#allocation30] sm:$0xff] %v4132_v50  ;;  %v4137_v12 = vadd.f32 %v2701_v5, %v4124_v49  ;;  %v1247_v57 = vmul.f32 1.442695, %v1229_v48 }
 0x40e   :  { %v1167_v56 = vpop.f32.mrf.mxu1 }
 0x40f   :  { %v1243_v51 = vmul.f32 1.442695, %v1227_v0  ;;  %v1230_v53 = vmul.f32 0.5, %v4137_v12  ;;  %2407 = vst [vmem:[#allocation30 + $0x18] sm:$0xff] %v4137_v12  ;;  %v4142_v14 = vadd.f32 %v4124_v49, %v1167_v56 }
 0x410   :  { %v2704_v4 = vpop.f32.mrf.mxu1 }
 0x411   :  { %2868 = vpow2.f32 %v1243_v51  ;;  %v1228_v55 = vmul.f32 0.5, %v4142_v14  ;;  %2405 = vst [vmem:[#allocation30 + $0x8] sm:$0xff] %v4142_v14  ;;  %v4147_v59 = vadd.f32 %v2704_v4, %v4124_v49  ;;  %v1249_v60 = vmul.f32 1.442695, %v1230_v53  ;;  %v1322_v51 = vpop.permute.xlu1 %1321 }
 0x412   :  { %2870 = vpow2.f32 %v1247_v57  ;;  %v1180_v61 = vpop.f32.mrf.mxu1 }
 0x413   :  { %v1245_v1 = vmul.f32 1.442695, %v1228_v55  ;;  %v1233_v26 = vmul.f32 0.5, %v4147_v59  ;;  %2410 = vst [vmem:[#allocation30 + $0x30] sm:$0xff] %v4147_v59  ;;  %v4152_v6 = vadd.f32 %v4124_v49, %v1180_v61 }
 0x414   :  { %v2705_v7 = vpop.f32.mrf.mxu1 }
 0x415   :  { %2872 = vpow2.f32 %v1245_v1  ;;  %v1231_v11 = vmul.f32 0.5, %v4152_v6  ;;  %2408 = vst [vmem:[#allocation30 + $0x20] sm:$0xff] %v4152_v6  ;;  %v4160_v13 = vadd.f32 %v2705_v7, %v4124_v49  ;;  %v1255_v15 = vmul.f32 1.442695, %v1233_v26 }
 0x416   :  { %2874 = vpow2.f32 %v1249_v60  ;;  %v1183_v16 = vpop.f32.mrf.mxu1 }
 0x417   :  { %v1251_v17 = vmul.f32 1.442695, %v1231_v11  ;;  %v1234_v19 = vmul.f32 0.5, %v4160_v13  ;;  %2411 = vst [vmem:[#allocation30 + $0x38] sm:$0xff] %v4160_v13  ;;  %v4165_v18 = vadd.f32 %v4124_v49, %v1183_v16 }
 0x418   :  { %v2708_v23 = vpop.f32.mrf.mxu1 }
 0x419   :  { %2876 = vpow2.f32 %v1251_v17  ;;  %v1232_v27 = vmul.f32 0.5, %v4165_v18  ;;  %2409 = vst [vmem:[#allocation30 + $0x28] sm:$0xff] %v4165_v18  ;;  %v4170_v28 = vadd.f32 %v2708_v23, %v4124_v49  ;;  %v1257_v29 = vmul.f32 1.442695, %v1234_v19  ;;  %v1326_v19 = vpop.permute.xlu1 %1325 }
 0x41a   :  { %2878 = vpow2.f32 %v1255_v15  ;;  %v1196_v31 = vpop.f32.mrf.mxu1 }
 0x41b   :  { %v1253_v37 = vmul.f32 1.442695, %v1232_v27  ;;  %v1237_v34 = vmul.f32 0.5, %v4170_v28  ;;  %2414 = vst [vmem:[#allocation30 + $0x50] sm:$0xff] %v4170_v28  ;;  %v4175_v39 = vadd.f32 %v4124_v49, %v1196_v31 }
 0x41c   :  { %v2709_v32 = vpop.f32.mrf.mxu1 }
 0x41d   :  { %2880 = vpow2.f32 %v1253_v37  ;;  %v1235_v30 = vmul.f32 0.5, %v4175_v39  ;;  %2412 = vst [vmem:[#allocation30 + $0x40] sm:$0xff] %v4175_v39  ;;  %v1263_v54 = vmul.f32 1.442695, %v1237_v34  ;;  %v4180_v47 = vadd.f32 %v2709_v32, %v4124_v49  ;;  %v1330_v32 = vpop.permute.xlu1 %1329 }
 0x41e   :  { %v2869_v35 = vpop.eup %2868  ;;  %v1199_v45 = vpop.f32.mrf.mxu1  ;;  %2882 = vpow2.f32 %v1257_v29 }
 0x41f   :  { %v2871_v40 = vpop.eup %2870  ;;  %v1355_v58 = vmul.f32 %v2869_v35, %v1308_v9  ;;  %v1259_v3 = vmul.f32 1.442695, %v1235_v30  ;;  %v4183_v62 = vadd.f32 %v4124_v49, %v1199_v45  ;;  %v1238_v2 = vmul.f32 0.5, %v4180_v47  ;;  %2415 = vst [vmem:[#allocation30 + $0x58] sm:$0xff] %v4180_v47 }
 0x420   :  { %v2712_v41 = vpop.f32.mrf.mxu1  ;;  %v1357_v43 = vmul.f32 %v2871_v40, %v1312_v63  ;;  %v1324_v63 = vpop.permute.xlu0 %1323 }
 0x421   :  { %2884 = vpow2.f32 %v1259_v3  ;;  %v1236_v52 = vmul.f32 0.5, %v4183_v62  ;;  %2413 = vst [vmem:[#allocation30 + $0x48] sm:$0xff] %v4183_v62  ;;  %v4190_v42 = vadd.f32 %v2712_v41, %v4124_v49  ;;  %1387 = vrot.lane.b32.xlu0 %v1355_v58, %s3377_s26  ;;  %v1265_v44 = vmul.f32 1.442695, %v1238_v2  ;;  %v1334_v58 = vpop.permute.xlu1 %1333 }
 0x422   :  { %v2873_v46 = vpop.eup %2872  ;;  %2886 = vpow2.f32 %v1263_v54  ;;  %v1212_v38 = vpop.f32.mrf.mxu1 }
 0x423   :  { %v2875_v48 = vpop.eup %2874  ;;  %v1356_v5 = vmul.f32 %v2873_v46, %v1310_v8  ;;  %v1261_v0 = vmul.f32 1.442695, %v1236_v52  ;;  %v1241_v57 = vmul.f32 0.5, %v4190_v42  ;;  %2418 = vst [vmem:[#allocation30 + $0x70] sm:$0xff] %v4190_v42  ;;  %v4196_v56 = vadd.f32 %v4124_v49, %v1212_v38 }
 0x424   :  { %v2713_v9 = vpop.f32.mrf.mxu1  ;;  %v1358_v55 = vmul.f32 %v2875_v48, %v1314_v25  ;;  %v1328_v31 = vpop.permute.xlu0 %1327 }
 0x425   :  { %2888 = vpow2.f32 %v1261_v0  ;;  %v1239_v53 = vmul.f32 0.5, %v4196_v56  ;;  %2416 = vst [vmem:[#allocation30 + $0x60] sm:$0xff] %v4196_v56  ;;  %1389 = vrot.lane.b32.xlu1 %v1356_v5, %s3377_s26  ;;  %1391 = vrot.lane.b32.xlu0 %v1357_v43, %s3377_s26  ;;  %v4203_v60 = vadd.f32 %v2713_v9, %v4124_v49  ;;  %v1271_v7 = vmul.f32 1.442695, %v1241_v57  ;;  %v1338_v38 = vpop.permute.xlu1 %1337 }
 0x426   :  { %v2877_v4 = vpop.eup %2876  ;;  %2890 = vpow2.f32 %v1265_v44  ;;  %v1215_v61 = vpop.f32.mrf.mxu1 }
 0x427   :  { %v2879_v1 = vpop.eup %2878  ;;  %v1359_v26 = vmul.f32 %v2877_v4, %v1316_v24  ;;  %v1267_v8 = vmul.f32 1.442695, %v1239_v53  ;;  %v4206_v10 = vadd.f32 %v4124_v49, %v1215_v61  ;;  %v1242_v11 = vmul.f32 0.5, %v4203_v60  ;;  %2419 = vst [vmem:[#allocation30 + $0x78] sm:$0xff] %v4203_v60 }
 0x428   :  { %v1361_v17 = vmul.f32 %v2879_v1, %v1320_v20  ;;  %v1332_v35 = vpop.permute.xlu0 %1331 }
 0x429   :  { %2892 = vpow2.f32 %v1267_v8  ;;  %v1240_v15 = vmul.f32 0.5, %v4206_v10  ;;  %2417 = vst [vmem:[#allocation30 + $0x68] sm:$0xff] %v4206_v10  ;;  %1393 = vrot.lane.b32.xlu1 %v1358_v55, %s3377_s26  ;;  %1395 = vrot.lane.b32.xlu0 %v1359_v26, %s3377_s26  ;;  %v1273_v49 = vmul.f32 1.442695, %v1242_v11 }
 0x42a   :  { %v2881_v16 = vpop.eup %2880  ;;  %2894 = vpow2.f32 %v1271_v7 }
 0x42b   :  { %v1360_v23 = vmul.f32 %v2881_v16, %v1318_v33  ;;  %v1269_v25 = vmul.f32 1.442695, %v1240_v15  ;;  %v2883_v27 = vpop.eup %2882 }
 0x42c   :  { %v1362_v37 = vmul.f32 %v2883_v27, %v1322_v51  ;;  %v1336_v20 = vpop.permute.xlu0 %1335 }
 0x42d   :  { %2896 = vpow2.f32 %v1269_v25  ;;  %1397 = vrot.lane.b32.xlu1 %v1360_v23, %s3377_s26  ;;  %1399 = vrot.lane.b32.xlu0 %v1361_v17, %s3377_s26 }
 0x42e   :  { %v2885_v24 = vpop.eup %2884  ;;  %2898 = vpow2.f32 %v1273_v49 }
 0x42f   :  { %v2887_v29 = vpop.eup %2886  ;;  %v1363_v34 = vmul.f32 %v2885_v24, %v1324_v63 }
 0x430   :  { %v1365_v33 = vmul.f32 %v2887_v29, %v1328_v31 }
 0x431   :  { %1401 = vrot.lane.b32.xlu1 %v1362_v37, %s3377_s26  ;;  %1403 = vrot.lane.b32.xlu0 %v1363_v34, %s3377_s26 }
 0x432   :  { %v2889_v30 = vpop.eup %2888 }
 0x433   :  { %v2891_v54 = vpop.eup %2890  ;;  %v1364_v45 = vmul.f32 %v2889_v30, %v1326_v19  ;;  %v2837_v30 = vld [vmem:[#allocation20 + $0x10] sm:$0xff]  }
 0x434   :  { %v1366_v3 = vmul.f32 %v2891_v54, %v1330_v32 }
 0x435   :  { %1405 = vrot.lane.b32.xlu1 %v1364_v45, %s3377_s26  ;;  %1407 = vrot.lane.b32.xlu0 %v1365_v33, %s3377_s26 }
 0x436   :  { %v2893_v40 = vpop.eup %2892 }
 0x437   :  { %v1367_v2 = vmul.f32 %v2893_v40, %v1332_v35  ;;  %v2895_v41 = vpop.eup %2894  ;;  %v4249_v35 = vld [vmem:[#allocation16] ss:$0 sm:$0xff] }
 0x438   :  { %v1369_v43 = vmul.f32 %v2895_v41, %v1336_v20 }
 0x439   :  { %1409 = vrot.lane.b32.xlu1 %v1366_v3, %s3377_s26  ;;  %1411 = vrot.lane.b32.xlu0 %v1367_v2, %s3377_s26 }
 0x43a   :  { %v2897_v52 = vpop.eup %2896 }
 0x43b   :  { %v1368_v46 = vmul.f32 %v2897_v52, %v1334_v58  ;;  %v2899_v44 = vpop.eup %2898 }
 0x43c   :  { %v1370_v48 = vmul.f32 %v2899_v44, %v1338_v38 }
 0x43d   :  { %1413 = vrot.lane.b32.xlu1 %v1368_v46, %s3377_s26  ;;  %1415 = vrot.lane.b32.xlu0 %v1369_v43, %s3377_s26 }
 0x441   :  { %1417 = vrot.lane.b32.xlu1 %v1370_v48, %s3377_s26  ;;  %s2437_s26 = sshll.u32 %s3392_s12, 4  ;;  %s2438_s26 = int_to_ptr.vmem [resolvable:$true] %s2437_s26 }
 0x442   :  { %s3308_s11 = scalar_lea.vmem %s2438_s26, 2048  ;;  %p3313_p2 = scmp.lt.s32.totalorder %s2438_s26, %s2438_s26 }
 0x443   :  { %p3309_p1 = scmp.ne.s32.totalorder %s2438_s26, %s3308_s11  ;;  %p3314_p3 = scmp.lt.s32.totalorder %s3308_s11, %s3308_s11 }
 0x445   :  { %p3315_p4 = por %p3314_p3, %p3313_p2 }
 0x447   :  { %p3316_p5 = pnand %p3315_p4, %p3309_p1 }
 0x493   :  { %v1388_v5 = vpop.permute.xlu0 %1387 }
 0x494   :  { %v1435_v9 = vadd.f32 %v1388_v5, %v4132_v50 }
 0x497   :  { %v1390_v0 = vpop.permute.xlu1 %1389  ;;  %v1392_v57 = vpop.permute.xlu0 %1391 }
 0x498   :  { %v1436_v51 = vadd.f32 %v1390_v0, %v4142_v14  ;;  %v1437_v61 = vadd.f32 %v1392_v57, %v4127_v36 }
 0x49a   :  { %v1459_v53 = vpack.c.bf16 %v1436_v51, %v1435_v9 }
 0x49b   :  { %v1394_v4 = vpop.permute.xlu1 %1393  ;;  %v1396_v55 = vpop.permute.xlu0 %1395 }
 0x49c   :  { %v1438_v63 = vadd.f32 %v1394_v4, %v4137_v12  ;;  %2722 = vmatprep.mubr.msk.bf16.mxu0 %vm882_vm0, %v1459_v53  ;;  %v1439_v8 = vadd.f32 %v1396_v55, %v4152_v6 }
 0x49e   :  { %v1460_v1 = vpack.c.bf16 %v1438_v63, %v1437_v61 }
 0x49f   :  { %v1398_v26 = vpop.permute.xlu1 %1397  ;;  %v1400_v7 = vpop.permute.xlu0 %1399 }
 0x4a0   :  { %v1440_v11 = vadd.f32 %v1398_v26, %v4165_v18  ;;  %2723 = vmatmul.mubr.msk.bf16.vlgmr.msra.gmra.mxu0 %vm882_vm0, %v1460_v1  ;;  %v1441_v16 = vadd.f32 %v1400_v7, %v4147_v59 }
 0x4a2   :  { %v1461_v50 = vpack.c.bf16 %v1440_v11, %v1439_v8 }
 0x4a3   :  { %v1402_v14 = vpop.permute.xlu1 %1401  ;;  %v1404_v15 = vpop.permute.xlu0 %1403 }
 0x4a4   :  { %v1442_v36 = vadd.f32 %v1402_v14, %v4160_v13  ;;  %2726 = vmatprep.mubr.msk.bf16.mxu0 %vm882_vm0, %v1461_v50  ;;  %v1443_v23 = vadd.f32 %v1404_v15, %v4175_v39 }
 0x4a6   :  { %v1462_v12 = vpack.c.bf16 %v1442_v36, %v1441_v16 }
 0x4a7   :  { %v1406_v17 = vpop.permute.xlu1 %1405  ;;  %v1408_v19 = vpop.permute.xlu0 %1407 }
 0x4a8   :  { %v1444_v6 = vadd.f32 %v1406_v17, %v4183_v62  ;;  %2727 = vmatmul.mubr.msk.bf16.gmra.mxu0 %vm882_vm0, %v1462_v12  ;;  %v1445_v27 = vadd.f32 %v1408_v19, %v4170_v28 }
 0x4aa   :  { %v1463_v18 = vpack.c.bf16 %v1444_v6, %v1443_v23 }
 0x4ab   :  { %v1410_v49 = vpop.permute.xlu1 %1409  ;;  %v1412_v25 = vpop.permute.xlu0 %1411 }
 0x4ac   :  { %v1446_v59 = vadd.f32 %v1410_v49, %v4180_v47  ;;  %2730 = vmatprep.mubr.msk.bf16.mxu0 %vm882_vm0, %v1463_v18  ;;  %v1447_v24 = vadd.f32 %v1412_v25, %v4196_v56  ;;  %v2836_v47 = vld [vmem:[#allocation20 + $0x18] sm:$0xff]   ;;  %v2838_v56 = vld [vmem:[#allocation20 + $0x8] sm:$0xff]  }
 0x4ad   :  { %2738 = vmatprep.subr.bf16.mxu1 %v2836_v47 }
 0x4ae   :  { %v1464_v13 = vpack.c.bf16 %v1446_v59, %v1445_v27  ;;  %2739 = vmatpush3.bf16.msra.mxu1 %v2836_v47 }
 0x4af   :  { %v1414_v31 = vpop.permute.xlu1 %1413  ;;  %v1416_v39 = vpop.permute.xlu0 %1415  ;;  %2740 = vmatprep.subr.bf16.mxu1 %v2837_v30 }
 0x4b0   :  { %v1448_v29 = vadd.f32 %v1414_v31, %v4206_v10  ;;  %2731 = vmatmul.mubr.msk.bf16.gmra.mxu0 %vm882_vm0, %v1464_v13  ;;  %v1449_v34 = vadd.f32 %v1416_v39, %v4190_v42  ;;  %v2839_v10 = vld [vmem:[#allocation20] sm:$0xff]  }
 0x4b2   :  { %v1465_v62 = vpack.c.bf16 %v1448_v29, %v1447_v24  ;;  %2741 = vmatpush3.bf16.msra.mxu1 %v2837_v30 }
 0x4b3   :  { %v1418_v37 = vpop.permute.xlu1 %1417  ;;  %2742 = vmatprep.subr.bf16.mxu1 %v2838_v56 }
 0x4b4   :  { %v1450_v32 = vadd.f32 %v1418_v37, %v4203_v60  ;;  %2734 = vmatprep.mubr.msk.bf16.mxu0 %vm882_vm0, %v1465_v62 }
 0x4b6   :  { %v1466_v28 = vpack.c.bf16 %v1450_v32, %v1449_v34  ;;  %2743 = vmatpush3.bf16.msra.mxu1 %v2838_v56 }
 0x4b7   :  { %2744 = vmatprep.subr.bf16.mxu1 %v2839_v10 }
 0x4b8   :  { %2735 = vmatmul.mubr.msk.bf16.gmra.mxu0 %vm882_vm0, %v1466_v28 }
 0x4ba   :  { %2745 = vmatpush3.bf16.msra.mxu1 %v2839_v10 }
 0x560   :  { %v2724_v42 = vpop.f32.mrf.mxu0 }
 0x561   :  { %v4255_v33 = vadd.f32 %v2724_v42, %v4249_v35 }
 0x562   :  { %v1556_v60 = vpop.f32.mrf.mxu0 }
 0x563   :  { %v4252_v54 = vadd.f32 %v4249_v35, %v1556_v60  ;;  %v1660_v20 = vmul.f32 %v4255_v33, %v4255_v33  ;;  %v1624_v44 = vsel %vm882_vm0, %v4255_v33, 0.0 }
 0x564   :  { %v2725_v45 = vpop.f32.mrf.mxu0 }
 0x565   :  { %v1658_v58 = vmul.f32 %v4252_v54, %v4252_v54  ;;  %v4260_v3 = vadd.f32 %v2725_v45, %v4249_v35  ;;  %v1621_v52 = vsel %vm882_vm0, %v4252_v54, 0.0  ;;  %v1677_v55 = vsel %vm882_vm0, %v1660_v20, 0.0 }
 0x566   :  { %v1559_v40 = vpop.f32.mrf.mxu0 }
 0x567   :  { %v4263_v2 = vadd.f32 %v4249_v35, %v1559_v40  ;;  %v1674_v5 = vsel %vm882_vm0, %v1658_v58, 0.0  ;;  %v1661_v0 = vmul.f32 %v4260_v3, %v4260_v3  ;;  %v1626_v61 = vsel %vm882_vm0, %v4260_v3, 0.0 }
 0x568   :  { %v2728_v41 = vpop.f32.mrf.mxu0 }
 0x569   :  { %v1622_v46 = vsel %vm882_vm0, %v4263_v2, 0.0  ;;  %v1659_v43 = vmul.f32 %v4263_v2, %v4263_v2  ;;  %v4286_v63 = vadd.f32 %v2728_v41, %v4249_v35  ;;  %v1679_v11 = vsel %vm882_vm0, %v1661_v0, 0.0 }
 0x56a   :  { %v1623_v38 = vadd.f32 %v1622_v46, %v1621_v52  ;;  %v1572_v48 = vpop.f32.mrf.mxu0 }
 0x56b   :  { %v1675_v57 = vsel %vm882_vm0, %v1659_v43, 0.0  ;;  %v4280_v9 = vadd.f32 %v4249_v35, %v1572_v48  ;;  %v1664_v17 = vmul.f32 %v4286_v63, %v4286_v63  ;;  %v1632_v27 = vsel %vm882_vm0, %v4286_v63, 0.0 }
 0x56c   :  { %v1625_v51 = vadd.f32 %v1624_v44, %v1623_v38  ;;  %v1676_v53 = vadd.f32 %v1675_v57, %v1674_v5  ;;  %v2729_v4 = vpop.f32.mrf.mxu0 }
 0x56d   :  { %v1662_v1 = vmul.f32 %v4280_v9, %v4280_v9  ;;  %v1628_v50 = vsel %vm882_vm0, %v4280_v9, 0.0  ;;  %v4294_v14 = vadd.f32 %v2729_v4, %v4249_v35  ;;  %v1685_v62 = vsel %vm882_vm0, %v1664_v17, 0.0 }
 0x56e   :  { %v1678_v26 = vadd.f32 %v1677_v55, %v1676_v53  ;;  %v1627_v7 = vadd.f32 %v1626_v61, %v1625_v51  ;;  %v1575_v8 = vpop.f32.mrf.mxu0 }
 0x56f   :  { %v4297_v15 = vadd.f32 %v4249_v35, %v1575_v8  ;;  %v1681_v19 = vsel %vm882_vm0, %v1662_v1, 0.0  ;;  %v1665_v59 = vmul.f32 %v4294_v14, %v4294_v14  ;;  %v1634_v37 = vsel %vm882_vm0, %v4294_v14, 0.0 }
 0x570   :  { %v1629_v16 = vadd.f32 %v1628_v50, %v1627_v7  ;;  %v1680_v36 = vadd.f32 %v1679_v11, %v1678_v26  ;;  %v2732_v12 = vpop.f32.mrf.mxu0 }
 0x571   :  { %v1630_v23 = vsel %vm882_vm0, %v4297_v15, 0.0  ;;  %v1663_v6 = vmul.f32 %v4297_v15, %v4297_v15  ;;  %v4318_v34 = vadd.f32 %v2732_v12, %v4249_v35  ;;  %v1687_v56 = vsel %vm882_vm0, %v1665_v59, 0.0 }
 0x572   :  { %v1682_v18 = vadd.f32 %v1681_v19, %v1680_v36  ;;  %v1631_v49 = vadd.f32 %v1630_v23, %v1629_v16  ;;  %v1588_v25 = vpop.f32.mrf.mxu0 }
 0x573   :  { %v1683_v13 = vsel %vm882_vm0, %v1663_v6, 0.0  ;;  %v4312_v31 = vadd.f32 %v4249_v35, %v1588_v25  ;;  %v1668_v41 = vmul.f32 %v4318_v34, %v4318_v34  ;;  %v1640_v48 = vsel %vm882_vm0, %v4318_v34, 0.0 }
 0x574   :  { %v1633_v24 = vadd.f32 %v1632_v27, %v1631_v49  ;;  %v1684_v29 = vadd.f32 %v1683_v13, %v1682_v18  ;;  %v2733_v39 = vpop.f32.mrf.mxu0 }
 0x575   :  { %v1666_v32 = vmul.f32 %v4312_v31, %v4312_v31  ;;  %v1636_v10 = vsel %vm882_vm0, %v4312_v31, 0.0  ;;  %v4326_v42 = vadd.f32 %v2733_v39, %v4249_v35  ;;  %v1693_v55 = vsel %vm882_vm0, %v1668_v41, 0.0 }
 0x576   :  { %v1686_v28 = vadd.f32 %v1685_v62, %v1684_v29  ;;  %v1635_v47 = vadd.f32 %v1634_v37, %v1633_v24  ;;  %v1591_v30 = vpop.f32.mrf.mxu0 }
 0x577   :  { %v4329_v60 = vadd.f32 %v4249_v35, %v1591_v30  ;;  %v1689_v20 = vsel %vm882_vm0, %v1666_v32, 0.0  ;;  %v1669_v5 = vmul.f32 %v4326_v42, %v4326_v42  ;;  %v1642_v61 = vsel %vm882_vm0, %v4326_v42, 0.0 }
 0x578   :  { %v1637_v45 = vadd.f32 %v1636_v10, %v1635_v47  ;;  %v1688_v40 = vadd.f32 %v1687_v56, %v1686_v28  ;;  %v2736_v58 = vpop.f32.mrf.mxu0 }
 0x579   :  { %v1638_v52 = vsel %vm882_vm0, %v4329_v60, 0.0  ;;  %v1667_v46 = vmul.f32 %v4329_v60, %v4329_v60  ;;  %v4350_v1 = vadd.f32 %v2736_v58, %v4249_v35  ;;  %v1695_v50 = vsel %vm882_vm0, %v1669_v5, 0.0 }
 0x57a   :  { %v1690_v43 = vadd.f32 %v1689_v20, %v1688_v40  ;;  %v1639_v44 = vadd.f32 %v1638_v52, %v1637_v45  ;;  %v1604_v38 = vpop.f32.mrf.mxu0 }
 0x57b   :  { %v1691_v0 = vsel %vm882_vm0, %v1667_v46, 0.0  ;;  %v4344_v57 = vadd.f32 %v4249_v35, %v1604_v38  ;;  %v1672_v23 = vmul.f32 %v4350_v1, %v4350_v1  ;;  %v1648_v59 = vsel %vm882_vm0, %v4350_v1, 0.0 }
 0x57c   :  { %v1641_v51 = vadd.f32 %v1640_v48, %v1639_v44  ;;  %v1692_v53 = vadd.f32 %v1691_v0, %v1690_v43  ;;  %v2737_v4 = vpop.f32.mrf.mxu0 }
 0x57d   :  { %v1670_v26 = vmul.f32 %v4344_v57, %v4344_v57  ;;  %v1644_v16 = vsel %vm882_vm0, %v4344_v57, 0.0  ;;  %v4358_v36 = vadd.f32 %v2737_v4, %v4249_v35  ;;  %v1701_v39 = vsel %vm882_vm0, %v1672_v23, 0.0  ;;  %v1619_v4 = vld [vmem:[#allocation17] sm:$0x1] }
 0x57e   :  { %v1694_v7 = vadd.f32 %v1693_v55, %v1692_v53  ;;  %v1643_v8 = vadd.f32 %v1642_v61, %v1641_v51  ;;  %v1607_v11 = vpop.f32.mrf.mxu0 }
 0x57f   :  { %v1608_v12 = vadd.f32 %v4249_v35, %v1607_v11  ;;  %v1697_v6 = vsel %vm882_vm0, %v1670_v26, 0.0  ;;  %v1673_v13 = vmul.f32 %v4358_v36, %v4358_v36  ;;  %v1650_v62 = vsel %vm882_vm0, %v4358_v36, 0.0  ;;  %v1620_v26 = vld [vmem:[#allocation19] sm:$0x1] }
 0x580   :  { %v1645_v17 = vadd.f32 %v1644_v16, %v1643_v8  ;;  %v1696_v19 = vadd.f32 %v1695_v50, %v1694_v7 }
 0x581   :  { %v1646_v18 = vsel %vm882_vm0, %v1608_v12, 0.0  ;;  %v1671_v49 = vmul.f32 %v1608_v12, %v1608_v12  ;;  %v1703_v28 = vsel %vm882_vm0, %v1673_v13, 0.0 }
 0x582   :  { %v1698_v25 = vadd.f32 %v1697_v6, %v1696_v19  ;;  %v1647_v27 = vadd.f32 %v1646_v18, %v1645_v17 }
 0x583   :  { %v1699_v35 = vsel %vm882_vm0, %v1671_v49, 0.0 }
 0x584   :  { %v1649_v24 = vadd.f32 %v1648_v59, %v1647_v27  ;;  %v1700_v29 = vadd.f32 %v1699_v35, %v1698_v25 }
 0x586   :  { %v1651_v37 = vadd.f32 %v1650_v62, %v1649_v24  ;;  %v1702_v32 = vadd.f32 %v1701_v39, %v1700_v29 }
 0x588   :  { %v1652_v47 = vrot.slane %v1651_v37, 4  ;;  %v1704_v30 = vadd.f32 %v1703_v28, %v1702_v32 }
 0x58a   :  { %v1653_v56 = vadd.f32 %v1652_v47, %v1651_v37  ;;  %v1705_v10 = vrot.slane %v1704_v30, 4 }
 0x58c   :  { %v1654_v45 = vrot.slane %v1653_v56, 2  ;;  %v1706_v40 = vadd.f32 %v1705_v10, %v1704_v30 }
 0x58e   :  { %v1655_v58 = vadd.f32 %v1654_v45, %v1653_v56  ;;  %v1707_v41 = vrot.slane %v1706_v40, 2 }
 0x590   :  { %v1656_v20 = vrot.slane %v1655_v58, 1  ;;  %v1708_v52 = vadd.f32 %v1707_v41, %v1706_v40 }
 0x592   :  { %v1657_v46 = vadd.f32 %v1656_v20, %v1655_v58  ;;  %v1709_v43 = vrot.slane %v1708_v52, 1 }
 0x594   :  { %v1710_v44 = vadd.f32 %v1709_v43, %v1708_v52  ;;  %v1711_v38 = vmul.f32 0.0078125, %v1657_v46 }
 0x596   :  { %v1712_v48 = vmul.f32 0.0078125, %v1710_v44  ;;  %v1713_v5 = vmul.f32 %v1711_v38, %v1711_v38 }
 0x598   :  { %v1714_v0 = vsub.f32 %v1712_v48, %v1713_v5 }
 0x59a   :  { %v1715_v51 = vmax.f32 %v1714_v0, 0.0 }
 0x59c   :  { %v1716_v53 = vadd.f32 1e-05, %v1715_v51 }
 0x59e   :  { %2900 = vrsqrt.f32 %v1716_v53 }
 0x5ab   :  { %v2901_v55 = vpop.eup %2900 }
 0x5ac   :  { %v1718_v61 = vmul.f32 %v2901_v55, %v1619_v4 }
 0x5ae   :  { %v1719_v7 = vmul.f32 %v1718_v61, %v1711_v38  ;;  %v4375_v8 = vrot.slane %v1718_v61, %v3797_v21 }
 0x5b0   :  { %v1720_v11 = vsub.f32 %v1620_v26, %v1719_v7  ;;  %v1740_v50 = vmul.f32 %v4375_v8, %v1608_v12  ;;  %v1727_v16 = vmul.f32 %v4375_v8, %v4252_v54  ;;  %v1728_v17 = vmul.f32 %v4375_v8, %v4263_v2 }
 0x5b1   :  { %v1729_v19 = vmul.f32 %v4375_v8, %v4255_v33  ;;  %v1730_v23 = vmul.f32 %v4375_v8, %v4260_v3  ;;  %v1731_v18 = vmul.f32 %v4375_v8, %v4280_v9  ;;  %v1732_v12 = vmul.f32 %v4375_v8, %v4297_v15 }
 0x5b2   :  { %v4387_v6 = vrot.slane %v1720_v11, %v3797_v21  ;;  %v1733_v54 = vmul.f32 %v4375_v8, %v4286_v63  ;;  %v1734_v2 = vmul.f32 %v4375_v8, %v4294_v14  ;;  %v1735_v33 = vmul.f32 %v4375_v8, %v4312_v31 }
 0x5b3   :  { %v1736_v3 = vmul.f32 %v4375_v8, %v4329_v60  ;;  %v1737_v49 = vmul.f32 %v4375_v8, %v4318_v34  ;;  %v1738_v63 = vmul.f32 %v4375_v8, %v4326_v42  ;;  %v1739_v28 = vmul.f32 %v4375_v8, %v4344_v57 }
 0x5b4   :  { %v1749_v9 = vadd.f32 %v4387_v6, %v1727_v16  ;;  %v1750_v25 = vadd.f32 %v4387_v6, %v1728_v17  ;;  %v1751_v15 = vadd.f32 %v4387_v6, %v1729_v19  ;;  %v1762_v14 = vadd.f32 %v4387_v6, %v1740_v50 }
 0x5b5   :  { %v1752_v27 = vadd.f32 %v4387_v6, %v1730_v23  ;;  %v1753_v31 = vadd.f32 %v4387_v6, %v1731_v18  ;;  %v1754_v60 = vadd.f32 %v4387_v6, %v1732_v12  ;;  %v1755_v34 = vadd.f32 %v4387_v6, %v1733_v54 }
 0x5b6   :  { %v1765_v59 = vmul.f32 0.2, %v1749_v9  ;;  %v1766_v13 = vmul.f32 0.2, %v1750_v25  ;;  %v1756_v35 = vadd.f32 %v4387_v6, %v1734_v2  ;;  %v1767_v24 = vmul.f32 0.2, %v1751_v15 }
 0x5b7   :  { %v1768_v29 = vmul.f32 0.2, %v1752_v27  ;;  %v1769_v39 = vmul.f32 0.2, %v1753_v31  ;;  %v1757_v62 = vadd.f32 %v4387_v6, %v1735_v33  ;;  %v1770_v32 = vmul.f32 0.2, %v1754_v60 }
 0x5b8   :  { %v1781_v42 = vmax.f32 %v1749_v9, %v1765_v59  ;;  %v1782_v37 = vmax.f32 %v1750_v25, %v1766_v13  ;;  %v1778_v47 = vmul.f32 0.2, %v1762_v14  ;;  %v1783_v30 = vmax.f32 %v1751_v15, %v1767_v24  ;;  %v2840_v15 = vld [vmem:[#allocation26 + $0x70] ss:$8 sps:$4 sm:$0xff]   ;;  %v2857_v59 = vld [vmem:[#allocation26 + $0x24] ss:$8 sps:$4 sm:$0xff]  }
 0x5b9   :  { %v1784_v56 = vmax.f32 %v1752_v27, %v1768_v29  ;;  %v1785_v10 = vmax.f32 %v1753_v31, %v1769_v39  ;;  %v1786_v40 = vmax.f32 %v1754_v60, %v1770_v32  ;;  %v1771_v58 = vmul.f32 0.2, %v1755_v34  ;;  %v2851_v27 = vld [vmem:[#allocation26 + $0x44] ss:$8 sps:$4 sm:$0xff]   ;;  %v2854_v31 = vld [vmem:[#allocation26 + $0x34] ss:$8 sps:$4 sm:$0xff]  }
 0x5ba   :  { %v1805_v45 = vpack.c.bf16 %v1782_v37, %v1781_v42  ;;  %v1758_v41 = vadd.f32 %v4387_v6, %v1736_v3  ;;  %v1772_v52 = vmul.f32 0.2, %v1756_v35  ;;  %v1773_v46 = vmul.f32 0.2, %v1757_v62  ;;  %v2852_v60 = vld [vmem:[#allocation26 + $0x30] ss:$8 sps:$4 sm:$0xff]  }
 0x5bb   :  { %v1806_v20 = vpack.c.bf16 %v1784_v56, %v1783_v30  ;;  %v1759_v43 = vadd.f32 %v4387_v6, %v1737_v49  ;;  %v1807_v44 = vpack.c.bf16 %v1786_v40, %v1785_v10  ;;  %v1760_v57 = vadd.f32 %v4387_v6, %v1738_v63  ;;  %v2846_v63 = vld [vmem:[#allocation26 + $0x50] ss:$8 sps:$4 sm:$0xff]   ;;  %v2863_v29 = vld [vmem:[#allocation26 + $0x4] ss:$8 sps:$4 sm:$0xff]   ;;  %v2861_v39 = vld [vmem:[#allocation26] ss:$8 sps:$4 sm:$0xff]  }
 0x5bc   :  { %2746 = vmatprep.mubr.msk.bf16.mxu1 %vm882_vm0, %v1805_v45  ;;  %v1774_v38 = vmul.f32 0.2, %v1758_v41  ;;  %v1789_v48 = vmax.f32 %v1757_v62, %v1773_v46  ;;  %v1761_v0 = vadd.f32 %v4387_v6, %v1739_v28  ;;  %v1794_v51 = vmax.f32 %v1762_v14, %v1778_v47  ;;  %v2849_v14 = vld [vmem:[#allocation26 + $0x40] ss:$8 sps:$4 sm:$0xff]   ;;  %v2858_v24 = vld [vmem:[#allocation26 + $0x10] ss:$8 sps:$4 sm:$0xff]  }
 0x5bd   :  { %2747 = vmatmul.mubr.msk.bf16.vlgmr.msra.gmra.mxu1 %vm882_vm0, %v1806_v20  ;;  %v1775_v5 = vmul.f32 0.2, %v1759_v43  ;;  %v1776_v4 = vmul.f32 0.2, %v1760_v57  ;;  %v1787_v55 = vmax.f32 %v1755_v34, %v1771_v58  ;;  %v1788_v61 = vmax.f32 %v1756_v35, %v1772_v52  ;;  %v2855_v34 = vld [vmem:[#allocation26 + $0x20] ss:$8 sps:$4 sm:$0xff]  }
 0x5be   :  { %2750 = vmatprep.mubr.msk.bf16.mxu1 %vm882_vm0, %v1807_v44  ;;  %v1790_v53 = vmax.f32 %v1758_v41, %v1774_v38  ;;  %v1777_v7 = vmul.f32 0.2, %v1761_v0  ;;  %v1741_v18 = vmul.f32 %v4375_v8, %v4350_v1  ;;  %v1742_v12 = vmul.f32 %v4375_v8, %v4358_v36  ;;  %v2842_v1 = vld [vmem:[#allocation26 + $0x74] ss:$8 sps:$4 sm:$0xff]   ;;  %v2845_v36 = vld [vmem:[#allocation26 + $0x64] ss:$8 sps:$4 sm:$0xff]  }
 0x5bf   :  { %v1791_v26 = vmax.f32 %v1759_v43, %v1775_v5  ;;  %v1792_v50 = vmax.f32 %v1760_v57, %v1776_v4  ;;  %v1808_v19 = vpack.c.bf16 %v1788_v61, %v1787_v55  ;;  %2227 = vmatprep.subr.bf16.mxu0 %v2842_v1  ;;  %v2843_v8 = vld [vmem:[#allocation26 + $0x60] ss:$8 sps:$4 sm:$0xff]   ;;  %v3391_v13 = vmov 0   ;;  %v2860_v35 = vld [vmem:[#allocation26 + $0x14] ss:$8 sps:$4 sm:$0xff]  }
 0x5c0   :  { %v1809_v11 = vpack.c.bf16 %v1790_v53, %v1789_v48  ;;  %v1793_v16 = vmax.f32 %v1761_v0, %v1777_v7  ;;  %v1763_v54 = vadd.f32 %v4387_v6, %v1741_v18  ;;  %v1764_v2 = vadd.f32 %v4387_v6, %v1742_v12  ;;  %2228 = vmatpush1.bf16.msra.mxu0 %v2840_v15  ;;  %v2848_v6 = vld [vmem:[#allocation26 + $0x54] ss:$8 sps:$4 sm:$0xff]   ;;  %v4436_v37 = vld [vmem:[#allocation22] ss:$0 sm:$0xff] }
 0x5c1   :  { %v1810_v17 = vpack.c.bf16 %v1792_v50, %v1791_v26  ;;  %2229 = vmatprep.subr.bf16.mxu0 %v2845_v36  ;;  %2259 = vmatprep.mubr.bf16.mxu0 %v3391_v13 }
 0x5c2   :  { %v1811_v23 = vpack.c.bf16 %v1794_v51, %v1793_v16  ;;  %v1779_v33 = vmul.f32 0.2, %v1763_v54  ;;  %v1780_v3 = vmul.f32 0.2, %v1764_v2 }
 0x5c4   :  { %v1795_v49 = vmax.f32 %v1763_v54, %v1779_v33  ;;  %v1796_v9 = vmax.f32 %v1764_v2, %v1780_v3  ;;  %2230 = vmatpush1.bf16.msra.mxu0 %v2843_v8 }
 0x5c5   :  { %2751 = vmatmul.mubr.msk.bf16.gmra.mxu1 %vm882_vm0, %v1808_v19  ;;  %2231 = vmatprep.subr.bf16.mxu0 %v2848_v6 }
 0x5c6   :  { %2754 = vmatprep.mubr.msk.bf16.mxu1 %vm882_vm0, %v1809_v11  ;;  %v1812_v25 = vpack.c.bf16 %v1796_v9, %v1795_v49 }
 0x5c8   :  { %2232 = vmatpush1.bf16.msra.mxu0 %v2846_v63 }
 0x5c9   :  { %2233 = vmatprep.subr.bf16.mxu0 %v2851_v27 }
 0x5cc   :  { %2234 = vmatpush1.bf16.msra.mxu0 %v2849_v14 }
 0x5cd   :  { %2755 = vmatmul.mubr.msk.bf16.gmra.mxu1 %vm882_vm0, %v1810_v17  ;;  %2235 = vmatprep.subr.bf16.mxu0 %v2854_v31 }
 0x5ce   :  { %2758 = vmatprep.mubr.msk.bf16.mxu1 %vm882_vm0, %v1811_v23 }
 0x5d0   :  { %2236 = vmatpush1.bf16.msra.mxu0 %v2852_v60 }
 0x5d1   :  { %2237 = vmatprep.subr.bf16.mxu0 %v2857_v59 }
 0x5d4   :  { %2238 = vmatpush1.bf16.msra.mxu0 %v2855_v34 }
 0x5d5   :  { %2759 = vmatmul.mubr.msk.bf16.gmra.mxu1 %vm882_vm0, %v1812_v25  ;;  %2239 = vmatprep.subr.bf16.mxu0 %v2860_v35 }
 0x5d8   :  { %2240 = vmatpush1.bf16.msra.mxu0 %v2858_v24 }
 0x5d9   :  { %2241 = vmatprep.subr.bf16.mxu0 %v2863_v29 }
 0x5dc   :  { %2242 = vmatpush1.bf16.msra.mxu0 %v2861_v39 }
 0x67d   :  { %v2748_v62 = vpop.f32.mrf.mxu1 }
 0x67e   :  { %v4442_v30 = vadd.f32 %v2748_v62, %v4436_v37 }
 0x67f   :  { %v1902_v42 = vpop.f32.mrf.mxu1 }
 0x680   :  { %v4439_v28 = vadd.f32 %v4436_v37, %v1902_v42  ;;  %v1990_v52 = vmul.f32 %v4442_v30, %v4442_v30 }
 0x681   :  { %v2749_v32 = vpop.f32.mrf.mxu1 }
 0x682   :  { %v1988_v45 = vmul.f32 %v4439_v28, %v4439_v28  ;;  %v4450_v40 = vadd.f32 %v2749_v32, %v4436_v37 }
 0x683   :  { %v1905_v47 = vpop.f32.mrf.mxu1 }
 0x684   :  { %v4445_v56 = vadd.f32 %v4436_v37, %v1905_v47  ;;  %v1991_v57 = vmul.f32 %v4450_v40, %v4450_v40 }
 0x685   :  { %v2752_v10 = vpop.f32.mrf.mxu1 }
 0x686   :  { %v1967_v58 = vadd.f32 %v4445_v56, %v4439_v28  ;;  %v1989_v41 = vmul.f32 %v4445_v56, %v4445_v56  ;;  %v4466_v0 = vadd.f32 %v2752_v10, %v4436_v37 }
 0x687   :  { %v1918_v20 = vpop.f32.mrf.mxu1 }
 0x688   :  { %v1968_v46 = vadd.f32 %v1967_v58, %v4442_v30  ;;  %v2004_v43 = vadd.f32 %v1989_v41, %v1988_v45  ;;  %v4460_v44 = vadd.f32 %v4436_v37, %v1918_v20  ;;  %v1994_v19 = vmul.f32 %v4466_v0, %v4466_v0 }
 0x689   :  { %v2753_v38 = vpop.f32.mrf.mxu1 }
 0x68a   :  { %v2005_v48 = vadd.f32 %v2004_v43, %v1990_v52  ;;  %v1969_v5 = vadd.f32 %v1968_v46, %v4450_v40  ;;  %v1992_v4 = vmul.f32 %v4460_v44, %v4460_v44  ;;  %v4475_v11 = vadd.f32 %v2753_v38, %v4436_v37 }
 0x68b   :  { %v1921_v51 = vpop.f32.mrf.mxu1 }
 0x68c   :  { %v1970_v53 = vadd.f32 %v1969_v5, %v4460_v44  ;;  %v2006_v55 = vadd.f32 %v2005_v48, %v1991_v57  ;;  %v4472_v61 = vadd.f32 %v4436_v37, %v1921_v51  ;;  %v1995_v2 = vmul.f32 %v4475_v11, %v4475_v11 }
 0x68d   :  { %v2756_v26 = vpop.f32.mrf.mxu1 }
 0x68e   :  { %v2007_v7 = vadd.f32 %v2006_v55, %v1992_v4  ;;  %v1971_v50 = vadd.f32 %v1970_v53, %v4472_v61  ;;  %v1993_v16 = vmul.f32 %v4472_v61, %v4472_v61  ;;  %v4490_v49 = vadd.f32 %v2756_v26, %v4436_v37 }
 0x68f   :  { %v1934_v17 = vpop.f32.mrf.mxu1 }
 0x690   :  { %v1972_v23 = vadd.f32 %v1971_v50, %v4466_v0  ;;  %v2008_v18 = vadd.f32 %v2007_v7, %v1993_v16  ;;  %v4484_v12 = vadd.f32 %v4436_v37, %v1934_v17  ;;  %v1998_v60 = vmul.f32 %v4490_v49, %v4490_v49 }
 0x691   :  { %v2757_v54 = vpop.f32.mrf.mxu1 }
 0x692   :  { %v2009_v33 = vadd.f32 %v2008_v18, %v1994_v19  ;;  %v1973_v3 = vadd.f32 %v1972_v23, %v4475_v11  ;;  %v1996_v1 = vmul.f32 %v4484_v12, %v4484_v12  ;;  %v4499_v63 = vadd.f32 %v2757_v54, %v4436_v37 }
 0x693   :  { %v1937_v9 = vpop.f32.mrf.mxu1 }
 0x694   :  { %v1974_v25 = vadd.f32 %v1973_v3, %v4484_v12  ;;  %v2010_v15 = vadd.f32 %v2009_v33, %v1995_v2  ;;  %v4496_v36 = vadd.f32 %v4436_v37, %v1937_v9  ;;  %v1999_v29 = vmul.f32 %v4499_v63, %v4499_v63 }
 0x695   :  { %v2760_v8 = vpop.f32.mrf.mxu1 }
 0x696   :  { %v2011_v6 = vadd.f32 %v2010_v15, %v1996_v1  ;;  %v1975_v14 = vadd.f32 %v1974_v25, %v4496_v36  ;;  %v1997_v27 = vmul.f32 %v4496_v36, %v4496_v36  ;;  %v4514_v42 = vadd.f32 %v2760_v8, %v4436_v37  ;;  %v1965_v15 = vld [vmem:[#allocation23] sm:$0x1] }
 0x697   :  { %v1950_v31 = vpop.f32.mrf.mxu1 }
 0x698   :  { %v1976_v59 = vadd.f32 %v1975_v14, %v4490_v49  ;;  %v2012_v34 = vadd.f32 %v2011_v6, %v1997_v27  ;;  %v4508_v35 = vadd.f32 %v4436_v37, %v1950_v31  ;;  %v2002_v43 = vmul.f32 %v4514_v42, %v4514_v42  ;;  %v1966_v14 = vld [vmem:[#allocation25] sm:$0x1] }
 0x699   :  { %v2761_v24 = vpop.f32.mrf.mxu1 }
 0x69a   :  { %v2013_v39 = vadd.f32 %v2012_v34, %v1998_v60  ;;  %v1977_v62 = vadd.f32 %v1976_v59, %v4499_v63  ;;  %v2000_v10 = vmul.f32 %v4508_v35, %v4508_v35  ;;  %v4521_v20 = vadd.f32 %v2761_v24, %v4436_v37 }
 0x69b   :  { %v1953_v32 = vpop.f32.mrf.mxu1 }
 0x69c   :  { %v1978_v47 = vadd.f32 %v1977_v62, %v4508_v35  ;;  %v2014_v45 = vadd.f32 %v2013_v39, %v1999_v29  ;;  %v1954_v58 = vadd.f32 %v4436_v37, %v1953_v32  ;;  %v2003_v48 = vmul.f32 %v4521_v20, %v4521_v20 }
 0x69e   :  { %v2015_v41 = vadd.f32 %v2014_v45, %v2000_v10  ;;  %v1979_v52 = vadd.f32 %v1978_v47, %v1954_v58  ;;  %v2001_v46 = vmul.f32 %v1954_v58, %v1954_v58 }
 0x6a0   :  { %v1980_v38 = vadd.f32 %v1979_v52, %v4514_v42  ;;  %v2016_v57 = vadd.f32 %v2015_v41, %v2001_v46 }
 0x6a2   :  { %v1981_v5 = vadd.f32 %v1980_v38, %v4521_v20  ;;  %v2017_v51 = vadd.f32 %v2016_v57, %v2002_v43 }
 0x6a4   :  { %v1982_v53 = vrot.slane %v1981_v5, 4  ;;  %v2018_v4 = vadd.f32 %v2017_v51, %v2003_v48 }
 0x6a6   :  { %v1983_v55 = vadd.f32 %v1982_v53, %v1981_v5  ;;  %v2019_v26 = vrot.slane %v2018_v4, 4 }
 0x6a8   :  { %v1984_v37 = vrot.slane %v1983_v55, 2  ;;  %v2020_v7 = vadd.f32 %v2019_v26, %v2018_v4 }
 0x6aa   :  { %v1985_v50 = vadd.f32 %v1984_v37, %v1983_v55  ;;  %v2021_v16 = vrot.slane %v2020_v7, 2 }
 0x6ac   :  { %v1986_v17 = vrot.slane %v1985_v50, 1  ;;  %v2022_v19 = vadd.f32 %v2021_v16, %v2020_v7 }
 0x6ae   :  { %v1987_v23 = vadd.f32 %v1986_v17, %v1985_v50  ;;  %v2023_v18 = vrot.slane %v2022_v19, 1 }
 0x6b0   :  { %v2024_v54 = vadd.f32 %v2023_v18, %v2022_v19  ;;  %v2025_v2 = vmul.f32 0.0078125, %v1987_v23 }
 0x6b2   :  { %v2026_v33 = vmul.f32 0.0078125, %v2024_v54  ;;  %v2027_v3 = vmul.f32 %v2025_v2, %v2025_v2 }
 0x6b4   :  { %v2028_v9 = vsub.f32 %v2026_v33, %v2027_v3 }
 0x6b6   :  { %v2029_v25 = vmax.f32 %v2028_v9, 0.0 }
 0x6b8   :  { %v2030_v1 = vadd.f32 1e-05, %v2029_v25 }
 0x6ba   :  { %2902 = vrsqrt.f32 %v2030_v1 }
 0x6c7   :  { %v2903_v8 = vpop.eup %2902 }
 0x6c8   :  { %v2032_v6 = vmul.f32 %v2903_v8, %v1965_v15 }
 0x6ca   :  { %v2033_v27 = vmul.f32 %v2032_v6, %v2025_v2  ;;  %v4530_v31 = vrot.slane %v2032_v6, %v3797_v21 }
 0x6cc   :  { %v2034_v60 = vsub.f32 %v1966_v14, %v2033_v27  ;;  %v2041_v34 = vmul.f32 %v4530_v31, %v4439_v28  ;;  %v2042_v24 = vmul.f32 %v4530_v31, %v4445_v56  ;;  %v2043_v29 = vmul.f32 %v4530_v31, %v4442_v30 }
 0x6cd   :  { %v2044_v32 = vmul.f32 %v4530_v31, %v4450_v40  ;;  %v2049_v10 = vmul.f32 %v4530_v31, %v4484_v12  ;;  %v2054_v56 = vmul.f32 %v4530_v31, %v1954_v58  ;;  %v2045_v30 = vmul.f32 %v4530_v31, %v4460_v44 }
 0x6ce   :  { %v4533_v59 = vrot.slane %v2034_v60, %v3797_v21  ;;  %v2050_v40 = vmul.f32 %v4530_v31, %v4496_v36  ;;  %v2051_v38 = vmul.f32 %v4530_v31, %v4490_v49  ;;  %v2052_v48 = vmul.f32 %v4530_v31, %v4499_v63 }
 0x6cf   :  { %v2053_v58 = vmul.f32 %v4530_v31, %v4508_v35  ;;  %v2046_v36 = vmul.f32 %v4530_v31, %v4472_v61  ;;  %v2047_v6 = vmul.f32 %v4530_v31, %v4466_v0  ;;  %v2048_v14 = vmul.f32 %v4530_v31, %v4475_v11 }
 0x6d0   :  { %v2063_v39 = vadd.f32 %v4533_v59, %v2041_v34  ;;  %v2064_v62 = vadd.f32 %v4533_v59, %v2042_v24  ;;  %v2065_v47 = vadd.f32 %v4533_v59, %v2043_v29  ;;  %v2066_v41 = vadd.f32 %v4533_v59, %v2044_v32 }
 0x6d1   :  { %v2071_v52 = vadd.f32 %v4533_v59, %v2049_v10  ;;  %v2076_v12 = vadd.f32 %v4533_v59, %v2054_v56  ;;  %v2072_v51 = vadd.f32 %v4533_v59, %v2050_v40  ;;  %v2067_v4 = vadd.f32 %v4533_v59, %v2045_v30 }
 0x6d2   :  { %v2079_v45 = vmul.f32 0.2, %v2063_v39  ;;  %v2080_v28 = vmul.f32 0.2, %v2064_v62  ;;  %v2081_v57 = vmul.f32 0.2, %v2065_v47  ;;  %v2073_v49 = vadd.f32 %v4533_v59, %v2051_v38 }
 0x6d3   :  { %v2082_v5 = vmul.f32 0.2, %v2066_v41  ;;  %v2087_v53 = vmul.f32 0.2, %v2071_v52  ;;  %v2088_v55 = vmul.f32 0.2, %v2072_v51  ;;  %v2074_v63 = vadd.f32 %v4533_v59, %v2052_v48 }
 0x6d4   :  { %v2095_v46 = vmax.f32 %v2063_v39, %v2079_v45  ;;  %v2096_v43 = vmax.f32 %v2064_v62, %v2080_v28  ;;  %v2075_v37 = vadd.f32 %v4533_v59, %v2053_v58  ;;  %v2097_v35 = vmax.f32 %v2065_v47, %v2081_v57 }
 0x6d5   :  { %v2103_v26 = vmax.f32 %v2071_v52, %v2087_v53  ;;  %v2068_v7 = vadd.f32 %v4533_v59, %v2046_v36  ;;  %v2089_v50 = vmul.f32 0.2, %v2073_v49  ;;  %v2092_v16 = vmul.f32 0.2, %v2076_v12 }
 0x6d6   :  { %v2127_v44 = vpack.c.bf16 %v2096_v43, %v2095_v46  ;;  %v2098_v17 = vmax.f32 %v2066_v41, %v2082_v5  ;;  %v2104_v61 = vmax.f32 %v2072_v51, %v2088_v55  ;;  %v2090_v19 = vmul.f32 0.2, %v2074_v63 }
 0x6d7   :  { %v2091_v23 = vmul.f32 0.2, %v2075_v37  ;;  %v2105_v18 = vmax.f32 %v2073_v49, %v2089_v50  ;;  %v2108_v54 = vmax.f32 %v2076_v12, %v2092_v16  ;;  %v2083_v9 = vmul.f32 0.2, %v2067_v4 }
 0x6d8   :  { %2260 = vmatmul.mubr.bf16.vlgmr.msra.gmra.mxu0 %v2127_v44  ;;  %v2131_v2 = vpack.c.bf16 %v2104_v61, %v2103_v26  ;;  %v2106_v33 = vmax.f32 %v2074_v63, %v2090_v19  ;;  %v2128_v25 = vpack.c.bf16 %v2098_v17, %v2097_v35  ;;  %v2084_v1 = vmul.f32 0.2, %v2068_v7 }
 0x6d9   :  { %2269 = vmatprep.mubr.bf16.mxu0 %v3391_v13  ;;  %v2107_v3 = vmax.f32 %v2075_v37, %v2091_v23  ;;  %v2099_v27 = vmax.f32 %v2067_v4, %v2083_v9  ;;  %v2069_v34 = vadd.f32 %v4533_v59, %v2047_v6  ;;  %v2070_v24 = vadd.f32 %v4533_v59, %v2048_v14 }
 0x6da   :  { %v2132_v15 = vpack.c.bf16 %v2106_v33, %v2105_v18  ;;  %v2100_v60 = vmax.f32 %v2068_v7, %v2084_v1  ;;  %v2055_v11 = vmul.f32 %v4530_v31, %v4514_v42  ;;  %v2056_v10 = vmul.f32 %v4530_v31, %v4521_v20 }
 0x6db   :  { %v2133_v8 = vpack.c.bf16 %v2108_v54, %v2107_v3  ;;  %v2085_v39 = vmul.f32 0.2, %v2069_v34  ;;  %v2086_v62 = vmul.f32 0.2, %v2070_v24 }
 0x6dc   :  { %v2129_v29 = vpack.c.bf16 %v2100_v60, %v2099_v27  ;;  %v2077_v45 = vadd.f32 %v4533_v59, %v2055_v11  ;;  %v2078_v28 = vadd.f32 %v4533_v59, %v2056_v10 }
 0x6dd   :  { %v2101_v32 = vmax.f32 %v2069_v34, %v2085_v39  ;;  %v2102_v47 = vmax.f32 %v2070_v24, %v2086_v62 }
 0x6de   :  { %v2093_v41 = vmul.f32 0.2, %v2077_v45  ;;  %v2094_v56 = vmul.f32 0.2, %v2078_v28 }
 0x6df   :  { %v2130_v0 = vpack.c.bf16 %v2102_v47, %v2101_v32 }
 0x6e0   :  { %2270 = vmatmul.mubr.bf16.gmra.mxu0 %v2128_v25  ;;  %v2109_v30 = vmax.f32 %v2077_v45, %v2093_v41  ;;  %v2110_v52 = vmax.f32 %v2078_v28, %v2094_v56 }
 0x6e1   :  { %2279 = vmatprep.mubr.bf16.mxu0 %v3391_v13 }
 0x6e2   :  { %v2134_v46 = vpack.c.bf16 %v2110_v52, %v2109_v30 }
 0x6e8   :  { %2280 = vmatmul.mubr.bf16.gmra.mxu0 %v2129_v29 }
 0x6e9   :  { %2289 = vmatprep.mubr.bf16.mxu0 %v3391_v13 }
 0x6f0   :  { %2290 = vmatmul.mubr.bf16.gmra.mxu0 %v2130_v0 }
 0x6f1   :  { %2299 = vmatprep.mubr.bf16.mxu0 %v3391_v13 }
 0x6f8   :  { %2300 = vmatmul.mubr.bf16.gmra.mxu0 %v2131_v2 }
 0x6f9   :  { %2309 = vmatprep.mubr.bf16.mxu0 %v3391_v13 }
 0x700   :  { %2310 = vmatmul.mubr.bf16.gmra.mxu0 %v2132_v15 }
 0x701   :  { %2319 = vmatprep.mubr.bf16.mxu0 %v3391_v13 }
 0x708   :  { %2320 = vmatmul.mubr.bf16.gmra.mxu0 %v2133_v8 }
 0x709   :  { %2329 = vmatprep.mubr.bf16.mxu0 %v3391_v13 }
 0x710   :  { %2330 = vmatmul.mubr.bf16.gmra.mxu0 %v2134_v46 }
 0x711   :  { %3319 = shalt.err (!%p3316_p5)
}
 0x712   :  { %2443 = dma.vmem_to_hbm [thread:$0]  %s2438_s26, 2048, %s4659_s23, [#allocation31], %s3380_s16, %s3380_s16, %s3381_s8   ;;  %v2135_v13 = vld [vmem:[#allocation28] sm:$0x3]  ;;  %v2143_v42 = vsub.s32 1, %v3794_v22 }
 0x713   :  { %v4597_v20 = vrot.slane %v2135_v13, %v3797_v21  ;;  %s3393_s23 = smov [#allocation29]  }
 0x714   :  { %v4599_v31 = vrot.slane %v2135_v13, %v2143_v42  ;;  %s2425_s16 = sshll.u32 %s3393_s23, 4  ;;  %s2426_s16 = int_to_ptr.vmem [resolvable:$true] %s2425_s16 }
 0x715   :  { %s3328_s8 = scalar_lea.vmem %s2426_s16, 4096  ;;  %p3333_p7 = scmp.lt.s32.totalorder %s2426_s16, %s2426_s16 }
 0x716   :  { %p3329_p6 = scmp.ne.s32.totalorder %s2426_s16, %s3328_s8  ;;  %p3334_p8 = scmp.lt.s32.totalorder %s3328_s8, %s3328_s8 }
 0x718   :  { %p3335_p9 = por %p3334_p8, %p3333_p7 }
 0x71a   :  { %p3336_p10 = pnand %p3335_p9, %p3329_p6 }
 0x798   :  { %v2261_v59 = vpop.f32.mrf.mxu0 }
 0x799   :  { %v2262_v43 = vadd.f32 %v2261_v59, %v4597_v20 }
 0x79a   :  { %v2263_v40 = vpop.f32.mrf.mxu0 }
 0x79b   :  { %2904 = vtanh.f32 %v2262_v43  ;;  %v2264_v38 = vadd.f32 %v2263_v40, %v4599_v31 }
 0x79c   :  { %v2265_v12 = vpop.f32.mrf.mxu0 }
 0x79d   :  { %2906 = vtanh.f32 %v2264_v38  ;;  %v2266_v57 = vadd.f32 %v2265_v12, %v4597_v20 }
 0x79e   :  { %v2267_v48 = vpop.f32.mrf.mxu0 }
 0x79f   :  { %2908 = vtanh.f32 %v2266_v57  ;;  %v2268_v22 = vadd.f32 %v2267_v48, %v4599_v31 }
 0x7a0   :  { %v2271_v58 = vpop.f32.mrf.mxu0 }
 0x7a1   :  { %2910 = vtanh.f32 %v2268_v22  ;;  %v2272_v21 = vadd.f32 %v2271_v58, %v4597_v20 }
 0x7a2   :  { %v2273_v44 = vpop.f32.mrf.mxu0 }
 0x7a3   :  { %2912 = vtanh.f32 %v2272_v21  ;;  %v2274_v5 = vadd.f32 %v2273_v44, %v4599_v31 }
 0x7a4   :  { %v2275_v51 = vpop.f32.mrf.mxu0 }
 0x7a5   :  { %2914 = vtanh.f32 %v2274_v5  ;;  %v2276_v53 = vadd.f32 %v2275_v51, %v4597_v20 }
 0x7a6   :  { %v2277_v36 = vpop.f32.mrf.mxu0 }
 0x7a7   :  { %2916 = vtanh.f32 %v2276_v53  ;;  %v2278_v4 = vadd.f32 %v2277_v36, %v4599_v31 }
 0x7a8   :  { %v2905_v49 = vpop.eup %2904  ;;  %v2281_v55 = vpop.f32.mrf.mxu0 }
 0x7a9   :  { %2372 = vst [vmem:[#allocation29] sm:$0xff] %v2905_v49  ;;  %2918 = vtanh.f32 %v2278_v4  ;;  %v2282_v26 = vadd.f32 %v2281_v55, %v4597_v20 }
 0x7aa   :  { %v2907_v63 = vpop.eup %2906  ;;  %v2283_v37 = vpop.f32.mrf.mxu0 }
 0x7ab   :  { %2373 = vst [vmem:[#allocation29 + $0x8] sm:$0xff] %v2907_v63  ;;  %2920 = vtanh.f32 %v2282_v26  ;;  %v2284_v35 = vadd.f32 %v2283_v37, %v4599_v31 }
 0x7ac   :  { %v2909_v7 = vpop.eup %2908  ;;  %v2285_v50 = vpop.f32.mrf.mxu0 }
 0x7ad   :  { %2374 = vst [vmem:[#allocation29 + $0x10] sm:$0xff] %v2909_v7  ;;  %2922 = vtanh.f32 %v2284_v35  ;;  %v2286_v16 = vadd.f32 %v2285_v50, %v4597_v20 }
 0x7ae   :  { %v2911_v17 = vpop.eup %2910  ;;  %v2287_v61 = vpop.f32.mrf.mxu0 }
 0x7af   :  { %2375 = vst [vmem:[#allocation29 + $0x18] sm:$0xff] %v2911_v17  ;;  %2924 = vtanh.f32 %v2286_v16  ;;  %v2288_v19 = vadd.f32 %v2287_v61, %v4599_v31 }
 0x7b0   :  { %v2913_v23 = vpop.eup %2912  ;;  %v2291_v18 = vpop.f32.mrf.mxu0 }
 0x7b1   :  { %2376 = vst [vmem:[#allocation29 + $0x20] sm:$0xff] %v2913_v23  ;;  %2926 = vtanh.f32 %v2288_v19  ;;  %v2292_v54 = vadd.f32 %v2291_v18, %v4597_v20 }
 0x7b2   :  { %v2915_v2 = vpop.eup %2914  ;;  %v2293_v33 = vpop.f32.mrf.mxu0 }
 0x7b3   :  { %2377 = vst [vmem:[#allocation29 + $0x28] sm:$0xff] %v2915_v2  ;;  %2928 = vtanh.f32 %v2292_v54  ;;  %v2294_v3 = vadd.f32 %v2293_v33, %v4599_v31 }
 0x7b4   :  { %v2917_v9 = vpop.eup %2916  ;;  %v2295_v25 = vpop.f32.mrf.mxu0 }
 0x7b5   :  { %2378 = vst [vmem:[#allocation29 + $0x30] sm:$0xff] %v2917_v9  ;;  %2930 = vtanh.f32 %v2294_v3  ;;  %v2296_v1 = vadd.f32 %v2295_v25, %v4597_v20 }
 0x7b6   :  { %v2919_v15 = vpop.eup %2918  ;;  %v2297_v8 = vpop.f32.mrf.mxu0 }
 0x7b7   :  { %2379 = vst [vmem:[#allocation29 + $0x38] sm:$0xff] %v2919_v15  ;;  %2932 = vtanh.f32 %v2296_v1  ;;  %v2298_v6 = vadd.f32 %v2297_v8, %v4599_v31 }
 0x7b8   :  { %v2921_v14 = vpop.eup %2920  ;;  %v2301_v27 = vpop.f32.mrf.mxu0 }
 0x7b9   :  { %2380 = vst [vmem:[#allocation29 + $0x40] sm:$0xff] %v2921_v14  ;;  %2934 = vtanh.f32 %v2298_v6  ;;  %v2302_v60 = vadd.f32 %v2301_v27, %v4597_v20 }
 0x7ba   :  { %v2923_v34 = vpop.eup %2922  ;;  %v2303_v24 = vpop.f32.mrf.mxu0 }
 0x7bb   :  { %2381 = vst [vmem:[#allocation29 + $0x48] sm:$0xff] %v2923_v34  ;;  %2936 = vtanh.f32 %v2302_v60  ;;  %v2304_v29 = vadd.f32 %v2303_v24, %v4599_v31 }
 0x7bc   :  { %v2925_v39 = vpop.eup %2924  ;;  %v2305_v62 = vpop.f32.mrf.mxu0 }
 0x7bd   :  { %2382 = vst [vmem:[#allocation29 + $0x50] sm:$0xff] %v2925_v39  ;;  %2938 = vtanh.f32 %v2304_v29  ;;  %v2306_v32 = vadd.f32 %v2305_v62, %v4597_v20 }
 0x7be   :  { %v2927_v47 = vpop.eup %2926  ;;  %v2307_v0 = vpop.f32.mrf.mxu0 }
 0x7bf   :  { %2383 = vst [vmem:[#allocation29 + $0x58] sm:$0xff] %v2927_v47  ;;  %2940 = vtanh.f32 %v2306_v32  ;;  %v2308_v11 = vadd.f32 %v2307_v0, %v4599_v31 }
 0x7c0   :  { %v2929_v10 = vpop.eup %2928  ;;  %v2311_v45 = vpop.f32.mrf.mxu0 }
 0x7c1   :  { %2384 = vst [vmem:[#allocation29 + $0x60] sm:$0xff] %v2929_v10  ;;  %2942 = vtanh.f32 %v2308_v11  ;;  %v2312_v28 = vadd.f32 %v2311_v45, %v4597_v20 }
 0x7c2   :  { %v2931_v41 = vpop.eup %2930  ;;  %v2313_v56 = vpop.f32.mrf.mxu0 }
 0x7c3   :  { %2385 = vst [vmem:[#allocation29 + $0x68] sm:$0xff] %v2931_v41  ;;  %2944 = vtanh.f32 %v2312_v28  ;;  %v2314_v30 = vadd.f32 %v2313_v56, %v4599_v31 }
 0x7c4   :  { %v2933_v52 = vpop.eup %2932  ;;  %v2315_v46 = vpop.f32.mrf.mxu0 }
 0x7c5   :  { %2386 = vst [vmem:[#allocation29 + $0x70] sm:$0xff] %v2933_v52  ;;  %2946 = vtanh.f32 %v2314_v30  ;;  %v2316_v13 = vadd.f32 %v2315_v46, %v4597_v20 }
 0x7c6   :  { %v2935_v42 = vpop.eup %2934  ;;  %v2317_v59 = vpop.f32.mrf.mxu0 }
 0x7c7   :  { %2387 = vst [vmem:[#allocation29 + $0x78] sm:$0xff] %v2935_v42  ;;  %2948 = vtanh.f32 %v2316_v13  ;;  %v2318_v43 = vadd.f32 %v2317_v59, %v4599_v31 }
 0x7c8   :  { %v2937_v40 = vpop.eup %2936  ;;  %v2321_v38 = vpop.f32.mrf.mxu0 }
 0x7c9   :  { %2388 = vst [vmem:[#allocation29 + $0x80] sm:$0xff] %v2937_v40  ;;  %2950 = vtanh.f32 %v2318_v43  ;;  %v2322_v12 = vadd.f32 %v2321_v38, %v4597_v20 }
 0x7ca   :  { %v2939_v57 = vpop.eup %2938  ;;  %v2323_v48 = vpop.f32.mrf.mxu0 }
 0x7cb   :  { %2389 = vst [vmem:[#allocation29 + $0x88] sm:$0xff] %v2939_v57  ;;  %2952 = vtanh.f32 %v2322_v12  ;;  %v2324_v22 = vadd.f32 %v2323_v48, %v4599_v31 }
 0x7cc   :  { %v2941_v58 = vpop.eup %2940  ;;  %v2325_v21 = vpop.f32.mrf.mxu0 }
 0x7cd   :  { %2390 = vst [vmem:[#allocation29 + $0x90] sm:$0xff] %v2941_v58  ;;  %2954 = vtanh.f32 %v2324_v22  ;;  %v2326_v44 = vadd.f32 %v2325_v21, %v4597_v20 }
 0x7ce   :  { %v2943_v5 = vpop.eup %2942  ;;  %v2327_v51 = vpop.f32.mrf.mxu0 }
 0x7cf   :  { %2391 = vst [vmem:[#allocation29 + $0x98] sm:$0xff] %v2943_v5  ;;  %2956 = vtanh.f32 %v2326_v44  ;;  %v2328_v53 = vadd.f32 %v2327_v51, %v4599_v31 }
 0x7d0   :  { %v2945_v36 = vpop.eup %2944  ;;  %v2331_v4 = vpop.f32.mrf.mxu0 }
 0x7d1   :  { %2392 = vst [vmem:[#allocation29 + $0xa0] sm:$0xff] %v2945_v36  ;;  %2958 = vtanh.f32 %v2328_v53  ;;  %v2332_v49 = vadd.f32 %v2331_v4, %v4597_v20 }
 0x7d2   :  { %v2947_v55 = vpop.eup %2946  ;;  %v2333_v26 = vpop.f32.mrf.mxu0 }
 0x7d3   :  { %2393 = vst [vmem:[#allocation29 + $0xa8] sm:$0xff] %v2947_v55  ;;  %2960 = vtanh.f32 %v2332_v49  ;;  %v2334_v63 = vadd.f32 %v2333_v26, %v4599_v31 }
 0x7d4   :  { %v2949_v37 = vpop.eup %2948  ;;  %v2335_v35 = vpop.f32.mrf.mxu0 }
 0x7d5   :  { %2394 = vst [vmem:[#allocation29 + $0xb0] sm:$0xff] %v2949_v37  ;;  %2962 = vtanh.f32 %v2334_v63  ;;  %v2336_v7 = vadd.f32 %v2335_v35, %v4597_v20 }
 0x7d6   :  { %v2951_v50 = vpop.eup %2950  ;;  %v2337_v16 = vpop.f32.mrf.mxu0 }
 0x7d7   :  { %2395 = vst [vmem:[#allocation29 + $0xb8] sm:$0xff] %v2951_v50  ;;  %2964 = vtanh.f32 %v2336_v7  ;;  %v2338_v17 = vadd.f32 %v2337_v16, %v4599_v31 }
 0x7d8   :  { %v2953_v61 = vpop.eup %2952 }
 0x7d9   :  { %2396 = vst [vmem:[#allocation29 + $0xc0] sm:$0xff] %v2953_v61  ;;  %2966 = vtanh.f32 %v2338_v17 }
 0x7da   :  { %v2955_v19 = vpop.eup %2954 }
 0x7db   :  { %2397 = vst [vmem:[#allocation29 + $0xc8] sm:$0xff] %v2955_v19 }
 0x7dc   :  { %v2957_v23 = vpop.eup %2956 }
 0x7dd   :  { %2398 = vst [vmem:[#allocation29 + $0xd0] sm:$0xff] %v2957_v23 }
 0x7de   :  { %v2959_v18 = vpop.eup %2958 }
 0x7df   :  { %2399 = vst [vmem:[#allocation29 + $0xd8] sm:$0xff] %v2959_v18 }
 0x7e0   :  { %v2961_v54 = vpop.eup %2960 }
 0x7e1   :  { %2400 = vst [vmem:[#allocation29 + $0xe0] sm:$0xff] %v2961_v54 }
 0x7e2   :  { %v2963_v2 = vpop.eup %2962 }
 0x7e3   :  { %2401 = vst [vmem:[#allocation29 + $0xe8] sm:$0xff] %v2963_v2 }
 0x7e4   :  { %v2965_v20 = vpop.eup %2964 }
 0x7e5   :  { %2402 = vst [vmem:[#allocation29 + $0xf0] sm:$0xff] %v2965_v20 }
 0x7e6   :  { %v2967_v33 = vpop.eup %2966 }
 0x7e7   :  { %2403 = vst [vmem:[#allocation29 + $0xf8] sm:$0xff] %v2967_v33 }
 0x7e8   :  { %3339 = shalt.err (!%p3336_p10)
}
 0x7e9   :  { %s3394_s14 = smov 256   ;;  %s3395_s20 = smov 16  }
 0x7ea   :  { %2431 = dma.vmem_to_hbm [thread:$0]  %s2426_s16, 4096, %s4658_s22, [#allocation4], %s3394_s14, %s3394_s14, %s3395_s20  }
 0x7eb   :  { %3366 = dma.done.wait [#allocation4], 4096  }
 0x7ec   :  { %3367 = vsyncadd [#allocation4], 4294963200 }
 0x7ed   :  { %3368 = dma.done.wait [#allocation31], 2048  }
 0x7ee   :  { %3369 = vsyncadd [#allocation31], 4294965248 }
 0x7ef   :  { %2450 = vsyncpa [#allocation3], 1 }
 0x7f0   :  { %2451 = vsyncpa [#allocation6], 1 }
 0x7f1   :  { %2452 = vsyncpa [#allocation9], 1 }
 0x7f2   :  { %2453 = vsyncpa [#allocation12], 1 }
 0x7f3   :  { %2454 = vsyncpa [#allocation15], 1 }
 0x7f4   :  { %2455 = vsyncpa [#allocation18], 1 }
 0x7f5   :  { %2456 = vsyncpa [#allocation21], 1 }
 0x7f6   :  { %2457 = vsyncpa [#allocation24], 1 }
 0x7f7   :  { %2458 = vsyncpa [#allocation27], 1 }
 0x7f8   :  { %2459 = vsyncpa [#allocation4], 1 }
 0x7f9   :  { %2460 = vsyncpa [#allocation31], 1 }

</bundles_post_ra>
